<compile_context>
chip_gen: v7x
topology: tpu7x:2x2x1
jax: 0.10.0
libtpu: 0.0.40
codegen_flags: <defaults>
</compile_context>

<pallas_src>
import functools

import jax
import jax.numpy as jnp
from jax import lax
from jax.experimental import pallas as pl
from jax.experimental.pallas import tpu as pltpu


def _ae_kernel(n_layers, activations, out_dim, compute_dtype, precision,
               x_ref, w_ref, b_ref, o_ref):
    """Fused MLP forward on a (block_b, features) tile.

      x_ref : (block_b, in_dim)            -- batch on sublanes, features on lanes
      w_ref : (n_layers, dmax, dmax)       -- zero-padded PyTorch-style (out, in) slabs
      b_ref : (n_layers, 1, dmax)          -- zero-padded biases
      o_ref : (block_b, out_dim)
    """
    h = x_ref[...].astype(jnp.float32)                     # (block_b, in_dim)
    dmax = w_ref.shape[1]
    if h.shape[1] < dmax:                                  # generic case; no-op here
        h = jnp.pad(h, ((0, 0), (0, dmax - h.shape[1])))
    for l in range(n_layers):
        w = w_ref[l]                                       # (dmax, dmax)  (out, in)
        b = b_ref[l].astype(jnp.float32)                   # (1, dmax)
        # h @ W^T on the MXU: contract feature axis of h with in-axis of W,
        # f32 accumulation regardless of operand dtype.
        h = lax.dot_general(
            h.astype(compute_dtype), w.astype(compute_dtype),
            (((1,), (1,)), ((), ())),
            preferred_element_type=jnp.float32,
            precision=precision) + b
        act = activations[l]
        if act == "relu":
            h = jnp.maximum(h, 0.0)
        elif act == "sigmoid":
            h = jax.nn.sigmoid(h)
        # act == "none" -> identity
    o_ref[...] = h[:, :out_dim].astype(o_ref.dtype)


def trajectories_ae_forward(x, params, activations, *, block_b=1024,
                            compute_dtype=jnp.float32):
    """Full autoencoder forward in one Pallas kernel, tiled over batch rows.

    x: any shape (B, ...) — flattened to (B, input_dim) as in forward().
    params: list of (W (out, in), b (out,) or (out, 1)) for encoder then decoder
            (PyTorch nn.Linear orientation).
    activations: per-layer activation names ("relu" / "sigmoid" / "none").
    block_b: target batch tile height (rows per grid step).
    compute_dtype: MXU operand dtype (f32 exact path, or bf16 on v6e/v7x).
    """
    B = x.shape[0]
    x2 = x.reshape(B, -1)                                  # (B, in_dim), no transpose
    in_dim = x2.shape[1]
    out_dim = params[-1][0].shape[0]
    n_layers = len(params)
    dmax = max(in_dim, max(max(w.shape) for w, _ in params))

    # ---- Pack all weights/biases into two zero-padded, fully-resident slabs.
    w_packed = jnp.zeros((n_layers, dmax, dmax), dtype=params[0][0].dtype)
    b_packed = jnp.zeros((n_layers, 1, dmax), dtype=params[0][1].dtype)
    for l, (w, b) in enumerate(params):
        o, i = w.shape
        w_packed = w_packed.at[l, :o, :i].set(w)
        b_packed = b_packed.at[l, 0, :o].set(b.reshape(-1))

    # ---- Batch tiling: minimal padding, multi-step grid when B > block_b.
    itemsize = x2.dtype.itemsize
    sublane = max(8, 32 // itemsize)                       # 8 (f32) / 16 (bf16) / 32 (i8)
    num_steps = max(1, pl.cdiv(B, block_b))
    block_b_eff = pl.cdiv(pl.cdiv(B, num_steps), sublane) * sublane
    padded_b = num_steps * block_b_eff
    if padded_b != B:
        x2 = jnp.pad(x2, ((0, padded_b - B), (0, 0)))

    # ---- f32 path: force exact MXU accumulation (DEFAULT may use bf16 passes).
    if jnp.dtype(compute_dtype) == jnp.dtype(jnp.float32):
        precision = lax.Precision.HIGHEST
    else:
        precision = lax.Precision.DEFAULT

    kernel = functools.partial(_ae_kernel, n_layers, tuple(activations),
                               out_dim, compute_dtype, precision)

    # ---- VMEM budget: double-buffered in/out tiles + resident params +
    #      headroom for f32 intermediates; capped for v7x's 64 MiB physical VMEM.
    tile_bytes = 2 * 2 * block_b_eff * (in_dim + out_dim) * itemsize
    inter_bytes = 8 * block_b_eff * dmax * 4
    param_bytes = 2 * (w_packed.size + b_packed.size) * 4
    vmem_limit = int(min(48 << 20,
                         max(32 << 20, tile_bytes + inter_bytes + param_bytes)))

    # ---- Advisory cost estimate for XLA scheduling around the custom call.
    flops = 2 * padded_b * n_layers * dmax * dmax
    bytes_accessed = (padded_b * in_dim * itemsize
                      + (w_packed.size + b_packed.size) * w_packed.dtype.itemsize
                      + padded_b * out_dim * itemsize)
    cost = pl.CostEstimate(flops=int(flops),
                           transcendentals=int(padded_b * out_dim),  # sigmoid
                           bytes_accessed=int(bytes_accessed))

    out = pl.pallas_call(
        kernel,
        out_shape=jax.ShapeDtypeStruct((padded_b, out_dim), x.dtype),
        grid=(num_steps,),
        in_specs=[
            pl.BlockSpec((block_b_eff, in_dim), lambda i: (i, 0)),
            # Packed params: constant index_map -> one prologue DMA, resident.
            pl.BlockSpec((n_layers, dmax, dmax), lambda i: (0, 0, 0)),
            pl.BlockSpec((n_layers, 1, dmax), lambda i: (0, 0, 0)),
        ],
        out_specs=pl.BlockSpec((block_b_eff, out_dim), lambda i: (i, 0)),
        compiler_params=pltpu.CompilerParams(
            dimension_semantics=("parallel",),
            vmem_limit_bytes=vmem_limit),
        cost_estimate=cost,
    )(x2, w_packed, b_packed)

    # Drop batch padding; output is already (B, out_dim) — no transpose needed.
    return out[:B]


def init_trajectories_ae(key, input_dim, encoding_dims, dtype=jnp.float32):
    """Deterministic init matching nn.Linear default U(-1/sqrt(fan_in), +1/sqrt(fan_in)).

    Weights are stored PyTorch-style: W (out_features, in_features), b (out_features, 1).
    """
    enc_dims = [input_dim] + list(encoding_dims)
    dec_dims = enc_dims[::-1]

    layer_dims = []
    activations = []
    # encoder: activation after every Linear
    for i in range(len(enc_dims) - 1):
        layer_dims.append((enc_dims[i], enc_dims[i + 1]))
        activations.append("relu")
    # decoder: activation between Linears, Sigmoid at the end
    for i in range(len(dec_dims) - 1):
        layer_dims.append((dec_dims[i], dec_dims[i + 1]))
        activations.append("relu" if i < len(dec_dims) - 2 else "sigmoid")

    params = []
    for (fan_in, fan_out) in layer_dims:
        key, kw, kb = jax.random.split(key, 3)
        bound = 1.0 / jnp.sqrt(jnp.array(fan_in, dtype=jnp.float32))
        w = jax.random.uniform(kw, (fan_out, fan_in), dtype, -bound, bound)
        b = jax.random.uniform(kb, (fan_out, 1), dtype, -bound, bound)
        params.append((w, b))
    return params, activations


def reference_forward(x, params, activations):
    """Pure-JAX reference of the PyTorch forward()."""
    h = x.reshape(x.shape[0], -1).astype(jnp.float32)
    for (w, b), act in zip(params, activations):
        h = jnp.dot(h, w.astype(jnp.float32).T,
                    precision=lax.Precision.HIGHEST) + b.astype(jnp.float32).reshape(1, -1)
        if act == "relu":
            h = jnp.maximum(h, 0.0)
        elif act == "sigmoid":
            h = jax.nn.sigmoid(h)
    return h


if __name__ == "__main__":
    key = jax.random.PRNGKey(0)
    k_param, k_x, k_x2 = jax.random.split(key, 3)

    # TrajectoriesAE(input_dim=64, encoding_dims=[32, 16, 8])
    input_dim = 64
    encoding_dims = [32, 16, 8]
    params, activations = init_trajectories_ae(k_param, input_dim, encoding_dims)

    # Trajectory observations: (B, 8, 8) — flattened to (B, 64) inside forward()
    x = jax.random.normal(k_x, (16, 8, 8), dtype=jnp.float32)
    ref = reference_forward(x, params, activations)

    # f32 MXU operands (exact path, all generations), single-step grid.
    out = trajectories_ae_forward(x, params, activations)
    out = jax.block_until_ready(out)
    assert out.shape == (16, input_dim), out.shape
    assert jnp.allclose(out, ref, atol=1e-5, rtol=1e-5), "f32 mismatch vs reference"

    # Ragged batch exercising a multi-step grid (3 steps, tail padding trimmed).
    x_big = jax.random.normal(k_x2, (300, 64), dtype=jnp.float32)
    ref_big = reference_forward(x_big, params, activations)
    out_big = trajectories_ae_forward(x_big, params, activations, block_b=128)
    out_big = jax.block_until_ready(out_big)
    assert out_big.shape == (300, input_dim), out_big.shape
    assert jnp.allclose(out_big, ref_big, atol=1e-5, rtol=1e-5), "multi-step mismatch"

    # bf16 MXU operands (v6e/v7x-native path), f32 accumulation + f32 activations.
    # NOTE: activations are re-cast to bf16 each layer, so error compounds across
    # the 6 layers; 2e-2 tolerance covers it.
    out_bf16 = trajectories_ae_forward(x, params, activations,
                                       compute_dtype=jnp.bfloat16)
    out_bf16 = jax.block_until_ready(out_bf16)
    assert jnp.allclose(out_bf16, ref, atol=2e-2, rtol=2e-2), "bf16 mismatch vs reference"

    print("KERNEL_OK")
</pallas_src>

<mosaic_0001>
module attributes {stable_mosaic.version = 11 : i64} {
  func.func @_ae_kernel(%arg0: i32, %arg1: memref<16x64xf32, #tpu.memory_space<vmem>>, %arg2: memref<6x64x64xf32, #tpu.memory_space<vmem>>, %arg3: memref<6x1x64xf32, #tpu.memory_space<vmem>>, %arg4: memref<16x64xf32, #tpu.memory_space<vmem>>) attributes {dimension_semantics = [#tpu.dimension_semantics<parallel>], iteration_bounds = array<i64: 1>, scalar_prefetch = 0 : i64, scratch_operands = 0 : i64, tpu.core_type = #tpu.core_type<tc>, window_params = [{transform_indices = @transform_0, window_bounds = array<i64: 16, 64>}, {pipeline_mode = #tpu.pipeline_mode<synchronous>, transform_indices = @transform_1, window_bounds = array<i64: 6, 64, 64>}, {pipeline_mode = #tpu.pipeline_mode<synchronous>, transform_indices = @transform_2, window_bounds = array<i64: 6, 1, 64>}, {transform_indices = @transform_3, window_bounds = array<i64: 16, 64>}]} {
    %c0 = arith.constant 0 : index
    %c0_0 = arith.constant 0 : index
    %0 = vector.load %arg1[%c0, %c0_0] : memref<16x64xf32, #tpu.memory_space<vmem>>, vector<16x64xf32>
    %c0_1 = arith.constant 0 : index
    %c0_2 = arith.constant 0 : index
    %c0_3 = arith.constant 0 : index
    %1 = vector.load %arg2[%c0_1, %c0_2, %c0_3] : memref<6x64x64xf32, #tpu.memory_space<vmem>>, vector<1x64x64xf32>
    %2 = vector.shape_cast %1 : vector<1x64x64xf32> to vector<64x64xf32>
    %c0_4 = arith.constant 0 : index
    %c0_5 = arith.constant 0 : index
    %c0_6 = arith.constant 0 : index
    %3 = vector.load %arg3[%c0_4, %c0_5, %c0_6] : memref<6x1x64xf32, #tpu.memory_space<vmem>>, vector<1x1x64xf32>
    %4 = vector.shape_cast %3 : vector<1x1x64xf32> to vector<1x64xf32>
    %cst = arith.constant dense<0.000000e+00> : vector<16x64xf32>
    %5 = tpu.matmul %0, %2, %cst {dimension_numbers = #tpu.dot_dimension_numbers<[1], [1], [0], [0], [0, 0, 1, 0], [], []>, precision = #tpu.contract_precision<fp32>} : vector<16x64xf32>, vector<64x64xf32>, vector<16x64xf32> -> vector<16x64xf32>
    %6 = vector.broadcast %4 : vector<1x64xf32> to vector<16x64xf32>
    %7 = arith.addf %5, %6 : vector<16x64xf32>
    %cst_7 = arith.constant 0.000000e+00 : f32
    %8 = vector.broadcast %cst_7 : f32 to vector<16x64xf32>
    %9 = arith.maximumf %7, %8 : vector<16x64xf32>
    %c1 = arith.constant 1 : index
    %c0_8 = arith.constant 0 : index
    %c0_9 = arith.constant 0 : index
    %10 = vector.load %arg2[%c1, %c0_8, %c0_9] : memref<6x64x64xf32, #tpu.memory_space<vmem>>, vector<1x64x64xf32>
    %11 = vector.shape_cast %10 : vector<1x64x64xf32> to vector<64x64xf32>
    %c1_10 = arith.constant 1 : index
    %c0_11 = arith.constant 0 : index
    %c0_12 = arith.constant 0 : index
    %12 = vector.load %arg3[%c1_10, %c0_11, %c0_12] : memref<6x1x64xf32, #tpu.memory_space<vmem>>, vector<1x1x64xf32>
    %13 = vector.shape_cast %12 : vector<1x1x64xf32> to vector<1x64xf32>
    %cst_13 = arith.constant dense<0.000000e+00> : vector<16x64xf32>
    %14 = tpu.matmul %9, %11, %cst_13 {dimension_numbers = #tpu.dot_dimension_numbers<[1], [1], [0], [0], [0, 0, 1, 0], [], []>, precision = #tpu.contract_precision<fp32>} : vector<16x64xf32>, vector<64x64xf32>, vector<16x64xf32> -> vector<16x64xf32>
    %15 = vector.broadcast %13 : vector<1x64xf32> to vector<16x64xf32>
    %16 = arith.addf %14, %15 : vector<16x64xf32>
    %cst_14 = arith.constant 0.000000e+00 : f32
    %17 = vector.broadcast %cst_14 : f32 to vector<16x64xf32>
    %18 = arith.maximumf %16, %17 : vector<16x64xf32>
    %c2 = arith.constant 2 : index
    %c0_15 = arith.constant 0 : index
    %c0_16 = arith.constant 0 : index
    %19 = vector.load %arg2[%c2, %c0_15, %c0_16] : memref<6x64x64xf32, #tpu.memory_space<vmem>>, vector<1x64x64xf32>
    %20 = vector.shape_cast %19 : vector<1x64x64xf32> to vector<64x64xf32>
    %c2_17 = arith.constant 2 : index
    %c0_18 = arith.constant 0 : index
    %c0_19 = arith.constant 0 : index
    %21 = vector.load %arg3[%c2_17, %c0_18, %c0_19] : memref<6x1x64xf32, #tpu.memory_space<vmem>>, vector<1x1x64xf32>
    %22 = vector.shape_cast %21 : vector<1x1x64xf32> to vector<1x64xf32>
    %cst_20 = arith.constant dense<0.000000e+00> : vector<16x64xf32>
    %23 = tpu.matmul %18, %20, %cst_20 {dimension_numbers = #tpu.dot_dimension_numbers<[1], [1], [0], [0], [0, 0, 1, 0], [], []>, precision = #tpu.contract_precision<fp32>} : vector<16x64xf32>, vector<64x64xf32>, vector<16x64xf32> -> vector<16x64xf32>
    %24 = vector.broadcast %22 : vector<1x64xf32> to vector<16x64xf32>
    %25 = arith.addf %23, %24 : vector<16x64xf32>
    %cst_21 = arith.constant 0.000000e+00 : f32
    %26 = vector.broadcast %cst_21 : f32 to vector<16x64xf32>
    %27 = arith.maximumf %25, %26 : vector<16x64xf32>
    %c3 = arith.constant 3 : index
    %c0_22 = arith.constant 0 : index
    %c0_23 = arith.constant 0 : index
    %28 = vector.load %arg2[%c3, %c0_22, %c0_23] : memref<6x64x64xf32, #tpu.memory_space<vmem>>, vector<1x64x64xf32>
    %29 = vector.shape_cast %28 : vector<1x64x64xf32> to vector<64x64xf32>
    %c3_24 = arith.constant 3 : index
    %c0_25 = arith.constant 0 : index
    %c0_26 = arith.constant 0 : index
    %30 = vector.load %arg3[%c3_24, %c0_25, %c0_26] : memref<6x1x64xf32, #tpu.memory_space<vmem>>, vector<1x1x64xf32>
    %31 = vector.shape_cast %30 : vector<1x1x64xf32> to vector<1x64xf32>
    %cst_27 = arith.constant dense<0.000000e+00> : vector<16x64xf32>
    %32 = tpu.matmul %27, %29, %cst_27 {dimension_numbers = #tpu.dot_dimension_numbers<[1], [1], [0], [0], [0, 0, 1, 0], [], []>, precision = #tpu.contract_precision<fp32>} : vector<16x64xf32>, vector<64x64xf32>, vector<16x64xf32> -> vector<16x64xf32>
    %33 = vector.broadcast %31 : vector<1x64xf32> to vector<16x64xf32>
    %34 = arith.addf %32, %33 : vector<16x64xf32>
    %cst_28 = arith.constant 0.000000e+00 : f32
    %35 = vector.broadcast %cst_28 : f32 to vector<16x64xf32>
    %36 = arith.maximumf %34, %35 : vector<16x64xf32>
    %c4 = arith.constant 4 : index
    %c0_29 = arith.constant 0 : index
    %c0_30 = arith.constant 0 : index
    %37 = vector.load %arg2[%c4, %c0_29, %c0_30] : memref<6x64x64xf32, #tpu.memory_space<vmem>>, vector<1x64x64xf32>
    %38 = vector.shape_cast %37 : vector<1x64x64xf32> to vector<64x64xf32>
    %c4_31 = arith.constant 4 : index
    %c0_32 = arith.constant 0 : index
    %c0_33 = arith.constant 0 : index
    %39 = vector.load %arg3[%c4_31, %c0_32, %c0_33] : memref<6x1x64xf32, #tpu.memory_space<vmem>>, vector<1x1x64xf32>
    %40 = vector.shape_cast %39 : vector<1x1x64xf32> to vector<1x64xf32>
    %cst_34 = arith.constant dense<0.000000e+00> : vector<16x64xf32>
    %41 = tpu.matmul %36, %38, %cst_34 {dimension_numbers = #tpu.dot_dimension_numbers<[1], [1], [0], [0], [0, 0, 1, 0], [], []>, precision = #tpu.contract_precision<fp32>} : vector<16x64xf32>, vector<64x64xf32>, vector<16x64xf32> -> vector<16x64xf32>
    %42 = vector.broadcast %40 : vector<1x64xf32> to vector<16x64xf32>
    %43 = arith.addf %41, %42 : vector<16x64xf32>
    %cst_35 = arith.constant 0.000000e+00 : f32
    %44 = vector.broadcast %cst_35 : f32 to vector<16x64xf32>
    %45 = arith.maximumf %43, %44 : vector<16x64xf32>
    %c5 = arith.constant 5 : index
    %c0_36 = arith.constant 0 : index
    %c0_37 = arith.constant 0 : index
    %46 = vector.load %arg2[%c5, %c0_36, %c0_37] : memref<6x64x64xf32, #tpu.memory_space<vmem>>, vector<1x64x64xf32>
    %47 = vector.shape_cast %46 : vector<1x64x64xf32> to vector<64x64xf32>
    %c5_38 = arith.constant 5 : index
    %c0_39 = arith.constant 0 : index
    %c0_40 = arith.constant 0 : index
    %48 = vector.load %arg3[%c5_38, %c0_39, %c0_40] : memref<6x1x64xf32, #tpu.memory_space<vmem>>, vector<1x1x64xf32>
    %49 = vector.shape_cast %48 : vector<1x1x64xf32> to vector<1x64xf32>
    %cst_41 = arith.constant dense<0.000000e+00> : vector<16x64xf32>
    %50 = tpu.matmul %45, %47, %cst_41 {dimension_numbers = #tpu.dot_dimension_numbers<[1], [1], [0], [0], [0, 0, 1, 0], [], []>, precision = #tpu.contract_precision<fp32>} : vector<16x64xf32>, vector<64x64xf32>, vector<16x64xf32> -> vector<16x64xf32>
    %51 = vector.broadcast %49 : vector<1x64xf32> to vector<16x64xf32>
    %52 = arith.addf %50, %51 : vector<16x64xf32>
    %53 = arith.negf %52 : vector<16x64xf32>
    %54 = math.exp %53 : vector<16x64xf32>
    %cst_42 = arith.constant 1.000000e+00 : f32
    %55 = vector.broadcast %cst_42 : f32 to vector<16x64xf32>
    %56 = arith.addf %55, %54 : vector<16x64xf32>
    %57 = arith.divf %55, %56 : vector<16x64xf32>
    %c0_43 = arith.constant 0 : index
    %c0_44 = arith.constant 0 : index
    %58 = vector.load %arg4[%c0_43, %c0_44] : memref<16x64xf32, #tpu.memory_space<vmem>>, vector<16x64xf32>
    tpu.vector_store %arg4[%c0_43, %c0_44], %57 {strides = array<i32>} : memref<16x64xf32, #tpu.memory_space<vmem>>, vector<16x64xf32>,
    return
  }
  func.func @transform_0(%arg0: i32) -> (i32, i32) {
    %c0_i32 = arith.constant 0 : i32
    %c0_i32_0 = arith.constant 0 : i32
    return %arg0, %c0_i32 : i32, i32
  }
  func.func @transform_1(%arg0: i32) -> (i32, i32, i32) {
    %c0_i32 = arith.constant 0 : i32
    %c0_i32_0 = arith.constant 0 : i32
    %c0_i32_1 = arith.constant 0 : i32
    %c0_i32_2 = arith.constant 0 : i32
    return %c0_i32, %c0_i32_0, %c0_i32_1 : i32, i32, i32
  }
  func.func @transform_2(%arg0: i32) -> (i32, i32, i32) {
    %c0_i32 = arith.constant 0 : i32
    %c0_i32_0 = arith.constant 0 : i32
    %c0_i32_1 = arith.constant 0 : i32
    %c0_i32_2 = arith.constant 0 : i32
    return %c0_i32, %c0_i32_0, %c0_i32_1 : i32, i32, i32
  }
  func.func @transform_3(%arg0: i32) -> (i32, i32) {
    %c0_i32 = arith.constant 0 : i32
    %c0_i32_0 = arith.constant 0 : i32
    return %arg0, %c0_i32 : i32, i32
  }
}

</mosaic_0001>

<bundles_post_ra>
// kernel: tpu_custom_call.1
= control target key start
LH: loop header
LB: loop body
LE: loop exit
PB: predicated region body
PF: predicated region fallthrough
CT: control target
= control target key end

     0   :  { %8 = vsyncpa [#allocation3], 0  ;;  %s6674_s0 = inlined_call_operand.hbm [shape: f32[16,64], index: 0, kind: input, shape index: {}]   ;;  %s6675_s1 = inlined_call_operand.hbm [shape: f32[6,64,64], index: 1, kind: input, shape index: {}]   ;;  %s6676_s2 = inlined_call_operand.vmem [shape: f32[6,1,64], index: 2, kind: input, shape index: {}]   ;;  %s6677_s3 = inlined_call_operand.hbm [shape: f32[16,64], index: 3, kind: output, shape index: {}]  }
   0x1   :  { %9 = vsyncpa [#allocation6], 0 }
   0x2   :  { %10 = vsyncpa [#allocation4], 0  ;;  %s5638_s12 = smov [#allocation2]   ;;  %s5566_s16 = scalar_lea.hbm %s6674_s0, 256 }
   0x3   :  { %s16_s13 = sshll.u32 %s5638_s12, 4  ;;  %p5567_p0 = scmp.ne.s32.totalorder %s6674_s0, %s5566_s16  ;;  %s17_s13 = int_to_ptr.vmem [resolvable:$true] %s16_s13 }
   0x4   :  { %p5570_p1 = scmp.lt.u32.totalorder %s5566_s16, %s6674_s0 }
   0x6   :  { %p5572_p2 = pnand %p5570_p1, %p5567_p0 }
   0x8   :  { %5575 = shalt.err (!%p5572_p2)
}
   0x9   :  { %s5576_s21 = scalar_lea.vmem %s17_s13, 256  ;;  %p5581_p4 = scmp.lt.s32.totalorder %s17_s13, %s17_s13 }
   0xa   :  { %p5577_p3 = scmp.ne.s32.totalorder %s17_s13, %s5576_s21  ;;  %p5582_p5 = scmp.lt.s32.totalorder %s5576_s21, %s5576_s21 }
   0xc   :  { %p5583_p6 = por %p5582_p5, %p5581_p4 }
   0xe   :  { %p5584_p7 = pnand %p5583_p6, %p5577_p3 }
  0x10   :  { %5587 = shalt.err (!%p5584_p7)
}
  0x11   :  { %s5639_s22 = smov 128   ;;  %s5640_s23 = smov 8  }
  0x12   :  { %22 = dma.hbm_to_vmem [thread:$0]  %s6674_s0, 256, %s17_s13, [#allocation3], %s5639_s22, %s5639_s22, %s5640_s23  }
  0x13   :  { %s5641_s26 = smov [#allocation5]   ;;  %s5588_s30 = scalar_lea.hbm %s6675_s1, 6144 }
  0x14   :  { %s28_s27 = sshll.u32 %s5641_s26, 4  ;;  %p5589_p8 = scmp.ne.s32.totalorder %s6675_s1, %s5588_s30  ;;  %s29_s27 = int_to_ptr.vmem [resolvable:$true] %s28_s27 }
  0x15   :  { %p5592_p9 = scmp.lt.u32.totalorder %s5588_s30, %s6675_s1 }
  0x17   :  { %p5594_p10 = pnand %p5592_p9, %p5589_p8 }
  0x19   :  { %5597 = shalt.err (!%p5594_p10)
}
  0x1a   :  { %s5598_s8 = scalar_lea.vmem %s29_s27, 6144  ;;  %p5603_p12 = scmp.lt.s32.totalorder %s29_s27, %s29_s27 }
  0x1b   :  { %p5599_p11 = scmp.ne.s32.totalorder %s29_s27, %s5598_s8  ;;  %p5604_p13 = scmp.lt.s32.totalorder %s5598_s8, %s5598_s8 }
  0x1d   :  { %p5605_p0 = por %p5604_p13, %p5603_p12 }
  0x1f   :  { %p5606_p1 = pnand %p5605_p0, %p5599_p11 }
  0x21   :  { %5609 = shalt.err (!%p5606_p1)
}
  0x22   :  { %34 = dma.hbm_to_vmem [thread:$0]  %s6675_s1, 6144, %s29_s27, [#allocation6], %s5639_s22, %s5639_s22, %s5640_s23  }
  0x23   :  { %5632 = dma.done.wait [#allocation3], 256  }
  0x24   :  { %5633 = vsyncadd [#allocation3], 4294967040 }
  0x25   :  { %5634 = dma.done.wait [#allocation6], 6144  }
  0x26   :  { %5635 = vsyncadd [#allocation6], 4294961152  ;;  %vm60_vm0 = vcmask 523264   ;;  %v45_v0 = vld [vmem:[#allocation5] sm:$0xff]  ;;  %v46_v1 = vld [vmem:[#allocation5 + $0x8] sm:$0xff]  ;;  %s5642_s21 = smov [#allocation7]  }
  0x27   :  { %v47_v2 = vld [vmem:[#allocation5 + $0x10] sm:$0xff]  ;;  %v68_v3 = vsel %vm60_vm0, %v45_v0, 0  ;;  %v71_v4 = vsel %vm60_vm0, %v46_v1, 0  ;;  %v48_v5 = vld [vmem:[#allocation5 + $0x18] sm:$0xff]  ;;  %v49_v7 = vld [vmem:[#allocation5 + $0x20] sm:$0xff]  ;;  %s3835_s24 = sshll.u32 %s5642_s21, 4  ;;  %s3836_s24 = int_to_ptr.vmem [resolvable:$true] %s3835_s24 }
  0x28   :  { %v74_v6 = vsel %vm60_vm0, %v47_v2, 0  ;;  %v50_v8 = vld [vmem:[#allocation5 + $0x28] sm:$0xff]  ;;  %v92_v9 = vand.u32 4294901760, %v68_v3  ;;  %v95_v10 = vand.u32 4294901760, %v71_v4  ;;  %v77_v11 = vsel %vm60_vm0, %v48_v5, 0  ;;  %v43_v14 = vld [vmem:[#allocation2] sm:$0xff]  ;;  %p5615_p3 = scmp.lt.s32.totalorder %s3836_s24, %s3836_s24 }
  0x29   :  { %v98_v12 = vand.u32 4294901760, %v74_v6  ;;  %v101_v13 = vand.u32 4294901760, %v77_v11  ;;  %v80_v16 = vsel %vm60_vm0, %v49_v7, 0  ;;  %v83_v17 = vsel %vm60_vm0, %v50_v8, 0  ;;  %v51_v23 = vld [vmem:[#allocation5 + $0x30] sm:$0xff]  ;;  %v52_v24 = vld [vmem:[#allocation5 + $0x38] sm:$0xff] }
  0x2a   :  { %v5697_v15 = vpack.c.bf16 %v95_v10, %v92_v9  ;;  %v62_v19 = vsel %vm60_vm0, %v43_v14, 0  ;;  %v104_v21 = vand.u32 4294901760, %v80_v16  ;;  %v107_v22 = vand.u32 4294901760, %v83_v17  ;;  %v44_v34 = vld [vmem:[#allocation2 + $0x8] sm:$0xff] }
  0x2b   :  { %v5701_v18 = vpack.c.bf16 %v101_v13, %v98_v12  ;;  %v5705_v20 = vand.u32 4294901760, %v62_v19  ;;  %v86_v26 = vsel %vm60_vm0, %v51_v23, 0  ;;  %v89_v27 = vsel %vm60_vm0, %v52_v24, 0  ;;  %v674_v23 = vld [vmem:[#allocation5 + $0x40] sm:$0xff]  ;;  %v675_v24 = vld [vmem:[#allocation5 + $0x48] sm:$0xff] }
  0x2c   :  { %4906 = vmatprep.subr.bf16.mxu0 %v5697_v15  ;;  %v5715_v29 = vpack.c.bf16 %v107_v22, %v104_v21  ;;  %v5717_v30 = vsub.f32 %v68_v3, %v92_v9  ;;  %v5719_v31 = vsub.f32 %v71_v4, %v95_v10  ;;  %v5721_v32 = vsub.f32 %v74_v6, %v98_v12 }
  0x2d   :  { %4908 = vmatpush3.bf16.xpose.msra.mxu0 %v5697_v15  ;;  %v5710_v25 = vsub.f32 %v62_v19, %v5705_v20  ;;  %v5726_v35 = vsub.f32 %v77_v11, %v101_v13  ;;  %v5728_v36 = vsub.f32 %v80_v16, %v104_v21  ;;  %v5730_v37 = vsub.f32 %v83_v17, %v107_v22 }
  0x2e   :  { %4910 = vmatprep.subr.bf16.mxu0 %v5701_v18  ;;  %v110_v38 = vand.u32 4294901760, %v86_v26  ;;  %v113_v40 = vand.u32 4294901760, %v89_v27  ;;  %v187_v41 = vand.u32 4294901760, %v5717_v30  ;;  %v194_v42 = vand.u32 4294901760, %v5719_v31 }
  0x2f   :  { %v166_v28 = vand.u32 4294901760, %v5710_v25  ;;  %v65_v43 = vsel %vm60_vm0, %v44_v34, 0  ;;  %v201_v44 = vand.u32 4294901760, %v5721_v32  ;;  %v208_v45 = vand.u32 4294901760, %v5726_v35 }
  0x30   :  { %v215_v46 = vand.u32 4294901760, %v5728_v36  ;;  %v222_v47 = vand.u32 4294901760, %v5730_v37  ;;  %v5741_v48 = vsub.f32 %v86_v26, %v110_v38  ;;  %v5743_v49 = vsub.f32 %v89_v27, %v113_v40  ;;  %v676_v26 = vld [vmem:[#allocation5 + $0x50] sm:$0xff] }
  0x31   :  { %v167_v33 = vsub.f32 %v5710_v25, %v166_v28  ;;  %v5745_v50 = vand.u32 4294901760, %v65_v43  ;;  %v5747_v51 = vpack.c.bf16 %v194_v42, %v187_v41  ;;  %v5749_v52 = vpack.c.bf16 %v208_v45, %v201_v44 }
  0x32   :  { %v5751_v53 = vpack.c.bf16 %v222_v47, %v215_v46  ;;  %v5753_v54 = vpack.c.bf16 %v113_v40, %v110_v38  ;;  %v188_v55 = vsub.f32 %v5717_v30, %v187_v41  ;;  %v195_v56 = vsub.f32 %v5719_v31, %v194_v42 }
  0x33   :  { %v168_v39 = vand.u32 4294901760, %v167_v33  ;;  %v229_v57 = vand.u32 4294901760, %v5741_v48  ;;  %v236_v58 = vand.u32 4294901760, %v5743_v49  ;;  %v5760_v59 = vsub.f32 %v65_v43, %v5745_v50 }
  0x34   :  { %v189_v61 = vand.u32 4294901760, %v188_v55  ;;  %v196_v62 = vand.u32 4294901760, %v195_v56  ;;  %v202_v1 = vsub.f32 %v5721_v32, %v201_v44  ;;  %v209_v2 = vsub.f32 %v5726_v35, %v208_v45 }
  0x35   :  { %4912 = vmatpush3.bf16.xpose.msra.mxu0 %v5701_v18  ;;  %4237 = vmatprep.mubr.f32.mxu0 %v168_v39  ;;  %v5763_v60 = vpack.c.bf16 %v236_v58, %v229_v57  ;;  %v176_v63 = vand.u32 4294901760, %v5760_v59  ;;  %v216_v8 = vsub.f32 %v5728_v36, %v215_v46  ;;  %v223_v9 = vsub.f32 %v5730_v37, %v222_v47 }
  0x36   :  { %4914 = vmatprep.subr.bf16.mxu0 %v5715_v29  ;;  %v4921_v0 = vpack.c.bf16 %v196_v62, %v189_v61  ;;  %v203_v4 = vand.u32 4294901760, %v202_v1  ;;  %v210_v5 = vand.u32 4294901760, %v209_v2  ;;  %v230_v13 = vsub.f32 %v5741_v48, %v229_v57 }
  0x37   :  { %v177_v3 = vsub.f32 %v5760_v59, %v176_v63  ;;  %v217_v10 = vand.u32 4294901760, %v216_v8  ;;  %v224_v11 = vand.u32 4294901760, %v223_v9  ;;  %v237_v14 = vsub.f32 %v5743_v49, %v236_v58 }
  0x38   :  { %v4925_v7 = vpack.c.bf16 %v210_v5, %v203_v4  ;;  %v231_v16 = vand.u32 4294901760, %v230_v13  ;;  %v4937_v21 = vpack.c.bf16 %v5719_v31, %v5717_v30  ;;  %v4941_v22 = vpack.c.bf16 %v5726_v35, %v5721_v32  ;;  %v677_v30 = vld [vmem:[#allocation5 + $0x58] sm:$0xff] }
  0x39   :  { %v178_v6 = vand.u32 4294901760, %v177_v3  ;;  %v4929_v12 = vpack.c.bf16 %v224_v11, %v217_v10  ;;  %v238_v17 = vand.u32 4294901760, %v237_v14  ;;  %v5785_v27 = vsel %vm60_vm0, %v674_v23, 0 }
  0x3a   :  { %v5788_v33 = vsel %vm60_vm0, %v675_v24, 0  ;;  %v5791_v31 = vsel %vm60_vm0, %v676_v26, 0  ;;  %v721_v32 = vand.u32 4294901760, %v5785_v27  ;;  %v5796_v35 = vsel %vm60_vm0, %v677_v30, 0 }
  0x3b   :  { %v4933_v19 = vpack.c.bf16 %v238_v17, %v231_v16  ;;  %v724_v34 = vand.u32 4294901760, %v5788_v33  ;;  %v727_v38 = vand.u32 4294901760, %v5791_v31  ;;  %v730_v39 = vand.u32 4294901760, %v5796_v35  ;;  %v3848_v17 = vld [vmem:[%s6676_s2] ss:$0 sm:$0xff] }
  0x3c   :  { %v4945_v42 = vpack.c.bf16 %v5730_v37, %v5728_v36  ;;  %v4949_v43 = vpack.c.bf16 %v5743_v49, %v5741_v48 }
  0x3d   :  { %4916 = vmatpush3.bf16.xpose.msra.mxu0 %v5715_v29  ;;  %v5804_v40 = vpack.c.bf16 %v724_v34, %v721_v32  ;;  %v5810_v41 = vpack.c.bf16 %v730_v39, %v727_v38 }
  0x3e   :  { %4918 = vmatprep.subr.bf16.mxu0 %v5753_v54 }
  0x3f   :  { %5002 = vmatprep.subr.bf16.mxu1 %v5804_v40 }
  0x40   :  { %5004 = vmatpush3.bf16.xpose.msra.mxu1 %v5804_v40 }
  0x41   :  { %5006 = vmatprep.subr.bf16.mxu1 %v5810_v41 }
  0x45   :  { %4920 = vmatpush3.bf16.xpose.msra.mxu0 %v5753_v54 }
  0x46   :  { %4922 = vmatprep.subr.bf16.mxu0 %v4921_v0 }
  0x48   :  { %5008 = vmatpush3.bf16.xpose.msra.mxu1 %v5810_v41 }
  0x4c   :  { %4238 = vmatmul.mubr.f32.vlgmr.msra.gmra.mrb[0].mxu0 %v178_v6 }
  0x4d   :  { %4924 = vmatpush3.bf16.xpose.msra.mxu0 %v4921_v0  ;;  %4256 = vmatprep.mubr.f32.mxu0 %v5705_v20 }
  0x4e   :  { %4926 = vmatprep.subr.bf16.mxu0 %v4925_v7 }
  0x55   :  { %4928 = vmatpush3.bf16.xpose.msra.mxu0 %v4925_v7 }
  0x56   :  { %4930 = vmatprep.subr.bf16.mxu0 %v4929_v12 }
  0x5d   :  { %4932 = vmatpush3.bf16.xpose.msra.mxu0 %v4929_v12 }
  0x5e   :  { %4934 = vmatprep.subr.bf16.mxu0 %v4933_v19 }
  0x65   :  { %4936 = vmatpush3.bf16.xpose.msra.mxu0 %v4933_v19 }
  0x66   :  { %4938 = vmatprep.subr.bf16.mxu0 %v4937_v21 }
  0x6c   :  { %4257 = vmatmul.mubr.f32.vlgmr.msra.gmra.mrb[0].mxu0 %v5745_v50 }
  0x6d   :  { %4940 = vmatpush3.bf16.xpose.msra.mxu0 %v4937_v21  ;;  %4275 = vmatprep.mubr.f32.mxu0 %v5710_v25  ;;  %v678_v25 = vld [vmem:[#allocation5 + $0x60] sm:$0xff]  ;;  %v5923_v21 = vsub.f32 %v5791_v31, %v727_v38 }
  0x6e   :  { %4942 = vmatprep.subr.bf16.mxu0 %v4941_v22 }
  0x6f   :  { %v830_v30 = vand.u32 4294901760, %v5923_v21 }
  0x75   :  { %4944 = vmatpush3.bf16.xpose.msra.mxu0 %v4941_v22  ;;  %v5928_v22 = vsub.f32 %v5796_v35, %v730_v39  ;;  %v831_v39 = vsub.f32 %v5923_v21, %v830_v30 }
  0x76   :  { %4946 = vmatprep.subr.bf16.mxu0 %v4945_v42 }
  0x7d   :  { %4948 = vmatpush3.bf16.xpose.msra.mxu0 %v4945_v42 }
  0x7e   :  { %4950 = vmatprep.subr.bf16.mxu0 %v4949_v43 }
  0x85   :  { %4952 = vmatpush3.bf16.xpose.msra.mxu0 %v4949_v43 }
  0x86   :  { %4954 = vmatprep.subr.bf16.mxu0 %v5697_v15 }
  0x8c   :  { %4276 = vmatmul.mubr.f32.vlgmr.msra.gmra.mrb[0].mxu0 %v5760_v59 }
  0x8d   :  { %4956 = vmatpush3.bf16.xpose.msra.mxu0 %v5697_v15  ;;  %4294 = vmatprep.mubr.f32.mxu0 %v166_v28  ;;  %v679_v28 = vld [vmem:[#allocation5 + $0x68] sm:$0xff] }
  0x8e   :  { %4958 = vmatprep.subr.bf16.mxu0 %v5701_v18 }
  0x95   :  { %4960 = vmatpush3.bf16.xpose.msra.mxu0 %v5701_v18 }
  0x96   :  { %4962 = vmatprep.subr.bf16.mxu0 %v5715_v29 }
  0x9d   :  { %4964 = vmatpush3.bf16.xpose.msra.mxu0 %v5715_v29 }
  0x9e   :  { %4966 = vmatprep.subr.bf16.mxu0 %v5753_v54 }
  0xa5   :  { %4968 = vmatpush3.bf16.xpose.msra.mxu0 %v5753_v54 }
  0xa6   :  { %4970 = vmatprep.subr.bf16.mxu0 %v5747_v51 }
  0xac   :  { %4295 = vmatmul.mubr.f32.vlgmr.msra.gmra.mrb[0].mxu0 %v176_v63 }
  0xad   :  { %4972 = vmatpush3.bf16.xpose.msra.mxu0 %v5747_v51  ;;  %4313 = vmatprep.mubr.f32.mxu0 %v5705_v20  ;;  %v5871_v51 = vsub.f32 %v5788_v33, %v724_v34 }
  0xae   :  { %4974 = vmatprep.subr.bf16.mxu0 %v5749_v52 }
  0xb5   :  { %4976 = vmatpush3.bf16.xpose.msra.mxu0 %v5749_v52 }
  0xb6   :  { %4978 = vmatprep.subr.bf16.mxu0 %v5751_v53 }
  0xbd   :  { %4980 = vmatpush3.bf16.xpose.msra.mxu0 %v5751_v53  ;;  %v823_v53 = vand.u32 4294901760, %v5871_v51 }
  0xbe   :  { %4982 = vmatprep.subr.bf16.mxu0 %v5763_v60 }
  0xbf   :  { %v824_v55 = vsub.f32 %v5871_v51, %v823_v53 }
  0xc1   :  { %v825_v57 = vand.u32 4294901760, %v824_v55  ;;  %v1305_v55 = vld [vmem:[#allocation5 + $0x90] sm:$0xff] }
  0xc5   :  { %4984 = vmatpush3.bf16.xpose.msra.mxu0 %v5763_v60 }
  0xc6   :  { %4986 = vmatprep.subr.bf16.mxu0 %v5697_v15 }
  0xcc   :  { %4314 = vmatmul.mubr.f32.vlgmr.msra.gmra.mrb[0].mxu0 %v5745_v50 }
  0xcd   :  { %4988 = vmatpush3.bf16.xpose.msra.mxu0 %v5697_v15  ;;  %4332 = vmatprep.mubr.f32.mxu0 %v5705_v20  ;;  %v709_v15 = vsel %vm60_vm0, %v678_v25, 0  ;;  %v712_v20 = vsel %vm60_vm0, %v679_v28, 0 }
  0xce   :  { %4990 = vmatprep.subr.bf16.mxu0 %v5701_v18  ;;  %v733_v36 = vand.u32 4294901760, %v709_v15  ;;  %v736_v37 = vand.u32 4294901760, %v712_v20 }
  0xd0   :  { %v5855_v44 = vpack.c.bf16 %v736_v37, %v733_v36  ;;  %v5883_v59 = vsub.f32 %v709_v15, %v733_v36  ;;  %v5885_v60 = vsub.f32 %v712_v20, %v736_v37  ;;  %v832_v36 = vand.u32 4294901760, %v831_v39 }
  0xd2   :  { %5010 = vmatprep.subr.bf16.mxu1 %v5855_v44  ;;  %v844_v61 = vand.u32 4294901760, %v5883_v59  ;;  %v851_v62 = vand.u32 4294901760, %v5885_v60  ;;  %v5911_v14 = vpack.c.bf16 %v5885_v60, %v5883_v59 }
  0xd3   :  { %5012 = vmatpush3.bf16.xpose.msra.mxu1 %v5855_v44 }
  0xd4   :  { %v845_v63 = vsub.f32 %v5883_v59, %v844_v61  ;;  %v852_v0 = vsub.f32 %v5885_v60, %v851_v62 }
  0xd5   :  { %4992 = vmatpush3.bf16.xpose.msra.mxu0 %v5701_v18  ;;  %v680_v18 = vld [vmem:[#allocation5 + $0x70] sm:$0xff] }
  0xd6   :  { %4994 = vmatprep.subr.bf16.mxu0 %v5715_v29  ;;  %v715_v45 = vsel %vm60_vm0, %v680_v18, 0  ;;  %v846_v1 = vand.u32 4294901760, %v845_v63  ;;  %v853_v2 = vand.u32 4294901760, %v852_v0  ;;  %v5961_v63 = vsel %vm60_vm0, %v1305_v55, 0 }
  0xd7   :  { %v739_v47 = vand.u32 4294901760, %v715_v45 }
  0xd8   :  { %v5025_v3 = vpack.c.bf16 %v853_v2, %v846_v1 }
  0xd9   :  { %v5895_v4 = vsub.f32 %v715_v45, %v739_v47 }
  0xdb   :  { %v858_v6 = vand.u32 4294901760, %v5895_v4 }
  0xdd   :  { %4996 = vmatpush3.bf16.xpose.msra.mxu0 %v5715_v29  ;;  %v681_v29 = vld [vmem:[#allocation5 + $0x78] sm:$0xff]  ;;  %v859_v8 = vsub.f32 %v5895_v4, %v858_v6 }
  0xde   :  { %4998 = vmatprep.subr.bf16.mxu0 %v5753_v54  ;;  %v718_v46 = vsel %vm60_vm0, %v681_v29, 0 }
  0xdf   :  { %v742_v48 = vand.u32 4294901760, %v718_v46  ;;  %v860_v10 = vand.u32 4294901760, %v859_v8 }
  0xe1   :  { %v5861_v49 = vpack.c.bf16 %v742_v48, %v739_v47  ;;  %v5897_v5 = vsub.f32 %v718_v46, %v742_v48  ;;  %v5037_v47 = vpack.c.bf16 %v5928_v22, %v5923_v21  ;;  %v1303_v48 = vld [vmem:[#allocation5 + $0x80] sm:$0xff] }
  0xe3   :  { %5014 = vmatprep.subr.bf16.mxu1 %v5861_v49  ;;  %v865_v7 = vand.u32 4294901760, %v5897_v5  ;;  %v5915_v16 = vpack.c.bf16 %v5897_v5, %v5895_v4 }
  0xe4   :  { %5016 = vmatpush3.bf16.xpose.msra.mxu1 %v5861_v49 }
  0xe5   :  { %5000 = vmatpush3.bf16.xpose.msra.mxu0 %v5753_v54  ;;  %v866_v9 = vsub.f32 %v5897_v5, %v865_v7 }
  0xe7   :  { %v867_v11 = vand.u32 4294901760, %v866_v9 }
  0xe9   :  { %v5029_v12 = vpack.c.bf16 %v867_v11, %v860_v10 }
  0xec   :  { %4333 = vmatmul.mubr.f32.vlgmr.msra.gmra.mrb[0].mxu0 %v5745_v50  ;;  %v5866_v50 = vsub.f32 %v5785_v27, %v721_v32  ;;  %v837_v32 = vand.u32 4294901760, %v5928_v22 }
  0xee   :  { %v816_v52 = vand.u32 4294901760, %v5866_v50  ;;  %v5033_v13 = vpack.c.bf16 %v5871_v51, %v5866_v50  ;;  %v838_v43 = vsub.f32 %v5928_v22, %v837_v32  ;;  %v5077_v51 = vpack.c.bf16 %v865_v7, %v858_v6 }
  0xf0   :  { %v817_v54 = vsub.f32 %v5866_v50, %v816_v52  ;;  %v839_v37 = vand.u32 4294901760, %v838_v43  ;;  %v5065_v11 = vpack.c.bf16 %v823_v53, %v816_v52  ;;  %v5073_v50 = vpack.c.bf16 %v851_v62, %v844_v61  ;;  %v1307_v52 = vld [vmem:[#allocation5 + $0xa0] sm:$0xff]  ;;  %v1308_v53 = vld [vmem:[#allocation5 + $0xa8] sm:$0xff] }
  0xf1   :  { %v1341_v59 = vsel %vm60_vm0, %v1308_v53, 0 }
  0xf2   :  { %v818_v56 = vand.u32 4294901760, %v817_v54  ;;  %v5021_v46 = vpack.c.bf16 %v839_v37, %v832_v36  ;;  %v1304_v54 = vld [vmem:[#allocation5 + $0x88] sm:$0xff]  ;;  %v1365_v61 = vand.u32 4294901760, %v1341_v59 }
  0xf4   :  { %v5017_v58 = vpack.c.bf16 %v825_v57, %v818_v56  ;;  %v5955_v56 = vsel %vm60_vm0, %v1303_v48, 0  ;;  %v5958_v57 = vsel %vm60_vm0, %v1304_v54, 0 }
  0xf5   :  { %v1350_v0 = vand.u32 4294901760, %v5955_v56  ;;  %v1353_v1 = vand.u32 4294901760, %v5958_v57 }
  0xf6   :  { %5018 = vmatprep.subr.bf16.mxu1 %v5017_v58 }
  0xf7   :  { %v5974_v9 = vpack.c.bf16 %v1353_v1, %v1350_v0 }
  0xf9   :  { %5098 = vmatprep.subr.bf16.mxu0 %v5974_v9 }
  0xfa   :  { %5100 = vmatpush3.bf16.xpose.msra.mxu0 %v5974_v9 }
 0x1bf   :  { %v4334_v19 = vpop.f32.mrb[0].mxu0 }
 0x1c0   :  { %v5481_v23 = vadd.f32 %v4334_v19, %v3848_v17  ;;  %v661_v24 = vpop.f32.mrb[1].mxu0 }
 0x1c1   :  { %v5482_v26 = vadd.f32 %v3848_v17, %v661_v24 }
 0x1c2   :  { %v672_v27 = vmax.f32 %v5481_v23, 0.0 }
 0x1c3   :  { %v671_v33 = vmax.f32 %v5482_v26, 0.0 }
 0x1c4   :  { %v694_v34 = vsel %vm60_vm0, %v672_v27, 0  ;;  %v6059_v27 = vsub.f32 %v1341_v59, %v1365_v61 }
 0x1c5   :  { %v5933_v42 = vand.u32 4294901760, %v694_v34  ;;  %v691_v31 = vsel %vm60_vm0, %v671_v33, 0 }
 0x1c6   :  { %v5936_v38 = vand.u32 4294901760, %v691_v31 }
 0x1c7   :  { %v5939_v35 = vsub.f32 %v694_v34, %v5933_v42 }
 0x1c8   :  { %v794_v25 = vsub.f32 %v691_v31, %v5936_v38 }
 0x1c9   :  { %v805_v28 = vand.u32 4294901760, %v5939_v35 }
 0x1ca   :  { %v795_v15 = vand.u32 4294901760, %v794_v25 }
 0x1cb   :  { %v806_v20 = vsub.f32 %v5939_v35, %v805_v28 }
 0x1cc   :  { %v796_v18 = vsub.f32 %v794_v25, %v795_v15 }
 0x1cd   :  { %v807_v45 = vand.u32 4294901760, %v806_v20 }
 0x1ce   :  { %v797_v29 = vand.u32 4294901760, %v796_v18 }
 0x1d0   :  { %4351 = vmatprep.mubr.f32.mxu1 %v797_v29 }
 0x1d1   :  { %4352 = vmatmul.mubr.f32.vlgmr.msra.gmra.mrb[0].mxu1 %v807_v45 }
 0x1d2   :  { %5020 = vmatpush3.bf16.xpose.msra.mxu1 %v5017_v58  ;;  %4370 = vmatprep.mubr.f32.mxu1 %v5936_v38  ;;  %v1306_v58 = vld [vmem:[#allocation5 + $0x98] sm:$0xff] }
 0x1d3   :  { %5022 = vmatprep.subr.bf16.mxu1 %v5021_v46  ;;  %v5966_v2 = vsel %vm60_vm0, %v1306_v58, 0 }
 0x1d4   :  { %v1359_v8 = vand.u32 4294901760, %v5966_v2 }
 0x1d6   :  { %v6102_v54 = vsub.f32 %v5966_v2, %v1359_v8 }
 0x1da   :  { %5024 = vmatpush3.bf16.xpose.msra.mxu1 %v5021_v46  ;;  %v3850_v46 = vld [vmem:[%s6676_s2 + $0x1] ss:$0 sm:$0xff] }
 0x1db   :  { %5026 = vmatprep.subr.bf16.mxu1 %v5025_v3 }
 0x1e2   :  { %5028 = vmatpush3.bf16.xpose.msra.mxu1 %v5025_v3  ;;  %v1356_v3 = vand.u32 4294901760, %v5961_v63 }
 0x1e3   :  { %5030 = vmatprep.subr.bf16.mxu1 %v5029_v12 }
 0x1e4   :  { %v5980_v10 = vpack.c.bf16 %v1359_v8, %v1356_v3  ;;  %v6097_v48 = vsub.f32 %v5961_v63, %v1356_v3 }
 0x1e6   :  { %5102 = vmatprep.subr.bf16.mxu0 %v5980_v10 }
 0x1e7   :  { %5104 = vmatpush3.bf16.xpose.msra.mxu0 %v5980_v10 }
 0x1ea   :  { %5032 = vmatpush3.bf16.xpose.msra.mxu1 %v5029_v12  ;;  %v5069_v12 = vpack.c.bf16 %v837_v32, %v830_v30  ;;  %v1480_v30 = vand.u32 4294901760, %v6059_v27 }
 0x1eb   :  { %5034 = vmatprep.subr.bf16.mxu1 %v5033_v13 }
 0x1ec   :  { %v1481_v34 = vsub.f32 %v6059_v27, %v1480_v30 }
 0x1ee   :  { %v1482_v31 = vand.u32 4294901760, %v1481_v34 }
 0x1f1   :  { %4371 = vmatmul.mubr.f32.vlgmr.msra.gmra.mrb[0].mxu1 %v5933_v42 }
 0x1f2   :  { %5036 = vmatpush3.bf16.xpose.msra.mxu1 %v5033_v13  ;;  %4389 = vmatprep.mubr.f32.mxu1 %v794_v25  ;;  %v6040_v13 = vsub.f32 %v5955_v56, %v1350_v0 }
 0x1f3   :  { %5038 = vmatprep.subr.bf16.mxu1 %v5037_v47 }
 0x1fa   :  { %5040 = vmatpush3.bf16.xpose.msra.mxu1 %v5037_v47 }
 0x1fb   :  { %5042 = vmatprep.subr.bf16.mxu1 %v5911_v14 }
 0x202   :  { %5044 = vmatpush3.bf16.xpose.msra.mxu1 %v5911_v14  ;;  %v6045_v14 = vsub.f32 %v5958_v57, %v1353_v1  ;;  %v1459_v1 = vand.u32 4294901760, %v6097_v48 }
 0x203   :  { %5046 = vmatprep.subr.bf16.mxu1 %v5915_v16 }
 0x204   :  { %v1452_v17 = vand.u32 4294901760, %v6045_v14  ;;  %v5129_v18 = vpack.c.bf16 %v6045_v14, %v6040_v13  ;;  %v1460_v8 = vsub.f32 %v6097_v48, %v1459_v1 }
 0x206   :  { %v1453_v21 = vsub.f32 %v6045_v14, %v1452_v17 }
 0x208   :  { %v1454_v23 = vand.u32 4294901760, %v1453_v21  ;;  %v1934_v21 = vld [vmem:[#allocation5 + $0xd0] sm:$0xff] }
 0x20a   :  { %5048 = vmatpush3.bf16.xpose.msra.mxu1 %v5915_v16  ;;  %v1445_v16 = vand.u32 4294901760, %v6040_v13 }
 0x20b   :  { %5050 = vmatprep.subr.bf16.mxu1 %v5804_v40 }
 0x20c   :  { %v1446_v19 = vsub.f32 %v6040_v13, %v1445_v16 }
 0x20e   :  { %v1447_v22 = vand.u32 4294901760, %v1446_v19  ;;  %v1933_v19 = vld [vmem:[#allocation5 + $0xc8] sm:$0xff] }
 0x210   :  { %v5113_v24 = vpack.c.bf16 %v1454_v23, %v1447_v22  ;;  %v6132_v23 = vsel %vm60_vm0, %v1933_v19, 0 }
 0x211   :  { %4390 = vmatmul.mubr.f32.vlgmr.msra.gmra.mrb[0].mxu1 %v5939_v35 }
 0x212   :  { %5052 = vmatpush3.bf16.xpose.msra.mxu1 %v5804_v40  ;;  %4408 = vmatprep.mubr.f32.mxu1 %v795_v15 }
 0x213   :  { %5054 = vmatprep.subr.bf16.mxu1 %v5810_v41 }
 0x21a   :  { %5056 = vmatpush3.bf16.xpose.msra.mxu1 %v5810_v41 }
 0x21b   :  { %5058 = vmatprep.subr.bf16.mxu1 %v5855_v44 }
 0x222   :  { %5060 = vmatpush3.bf16.xpose.msra.mxu1 %v5855_v44 }
 0x223   :  { %5062 = vmatprep.subr.bf16.mxu1 %v5861_v49 }
 0x22a   :  { %5064 = vmatpush3.bf16.xpose.msra.mxu1 %v5861_v49 }
 0x22b   :  { %5066 = vmatprep.subr.bf16.mxu1 %v5065_v11 }
 0x231   :  { %4409 = vmatmul.mubr.f32.vlgmr.msra.gmra.mrb[0].mxu1 %v805_v28 }
 0x232   :  { %5068 = vmatpush3.bf16.xpose.msra.mxu1 %v5065_v11  ;;  %4427 = vmatprep.mubr.f32.mxu1 %v5936_v38  ;;  %v1466_v11 = vand.u32 4294901760, %v6102_v54 }
 0x233   :  { %5070 = vmatprep.subr.bf16.mxu1 %v5069_v12 }
 0x23a   :  { %5072 = vmatpush3.bf16.xpose.msra.mxu1 %v5069_v12 }
 0x23b   :  { %5074 = vmatprep.subr.bf16.mxu1 %v5073_v50 }
 0x242   :  { %5076 = vmatpush3.bf16.xpose.msra.mxu1 %v5073_v50 }
 0x243   :  { %5078 = vmatprep.subr.bf16.mxu1 %v5077_v51 }
 0x24a   :  { %5080 = vmatpush3.bf16.xpose.msra.mxu1 %v5077_v51  ;;  %v1467_v51 = vsub.f32 %v6102_v54, %v1466_v11 }
 0x24b   :  { %5082 = vmatprep.subr.bf16.mxu1 %v5804_v40 }
 0x251   :  { %4428 = vmatmul.mubr.f32.vlgmr.msra.gmra.mrb[0].mxu1 %v5933_v42 }
 0x252   :  { %5084 = vmatpush3.bf16.xpose.msra.mxu1 %v5804_v40  ;;  %4446 = vmatprep.mubr.f32.mxu1 %v5936_v38  ;;  %v1338_v40 = vsel %vm60_vm0, %v1307_v52, 0 }
 0x253   :  { %5086 = vmatprep.subr.bf16.mxu1 %v5810_v41  ;;  %v1362_v60 = vand.u32 4294901760, %v1338_v40 }
 0x255   :  { %v6029_v62 = vpack.c.bf16 %v1365_v61, %v1362_v60  ;;  %v6057_v26 = vsub.f32 %v1338_v40, %v1362_v60  ;;  %v1461_v60 = vand.u32 4294901760, %v1460_v8  ;;  %v1468_v61 = vand.u32 4294901760, %v1467_v51 }
 0x257   :  { %5106 = vmatprep.subr.bf16.mxu0 %v6029_v62  ;;  %v1473_v33 = vand.u32 4294901760, %v6057_v26  ;;  %v6085_v29 = vpack.c.bf16 %v6059_v27, %v6057_v26 }
 0x258   :  { %5108 = vmatpush3.bf16.xpose.msra.mxu0 %v6029_v62 }
 0x259   :  { %v1474_v32 = vsub.f32 %v6057_v26, %v1473_v33  ;;  %v5169_v13 = vpack.c.bf16 %v1480_v30, %v1473_v33 }
 0x25a   :  { %5088 = vmatpush3.bf16.xpose.msra.mxu1 %v5810_v41  ;;  %v1309_v41 = vld [vmem:[#allocation5 + $0xb0] sm:$0xff] }
 0x25b   :  { %5090 = vmatprep.subr.bf16.mxu1 %v5855_v44 }
 0x262   :  { %5092 = vmatpush3.bf16.xpose.msra.mxu1 %v5855_v44  ;;  %v1310_v44 = vld [vmem:[#allocation5 + $0xb8] sm:$0xff] }
 0x263   :  { %5094 = vmatprep.subr.bf16.mxu1 %v5861_v49  ;;  %v1347_v4 = vsel %vm60_vm0, %v1310_v44, 0 }
 0x264   :  { %v1371_v6 = vand.u32 4294901760, %v1347_v4 }
 0x266   :  { %v6071_v39 = vsub.f32 %v1347_v4, %v1371_v6  ;;  %v5117_v4 = vpack.c.bf16 %v1468_v61, %v1461_v60 }
 0x268   :  { %v1494_v25 = vand.u32 4294901760, %v6071_v39 }
 0x26a   :  { %5096 = vmatpush3.bf16.xpose.msra.mxu1 %v5861_v49  ;;  %v1344_v49 = vsel %vm60_vm0, %v1309_v41, 0  ;;  %v1495_v15 = vsub.f32 %v6071_v39, %v1494_v25 }
 0x26b   :  { %v1368_v5 = vand.u32 4294901760, %v1344_v49 }
 0x26c   :  { %v1496_v36 = vand.u32 4294901760, %v1495_v15 }
 0x26d   :  { %v6035_v7 = vpack.c.bf16 %v1371_v6, %v1368_v5  ;;  %v6069_v35 = vsub.f32 %v1344_v49, %v1368_v5  ;;  %v5133_v5 = vpack.c.bf16 %v6102_v54, %v6097_v48  ;;  %v1932_v6 = vld [vmem:[#allocation5 + $0xc0] sm:$0xff] }
 0x26e   :  { %v6129_v22 = vsel %vm60_vm0, %v1932_v6, 0 }
 0x26f   :  { %5110 = vmatprep.subr.bf16.mxu0 %v6035_v7  ;;  %v1487_v43 = vand.u32 4294901760, %v6069_v35  ;;  %v6089_v45 = vpack.c.bf16 %v6071_v39, %v6069_v35  ;;  %v1979_v34 = vand.u32 4294901760, %v6129_v22 }
 0x270   :  { %5112 = vmatpush3.bf16.xpose.msra.mxu0 %v6035_v7 }
 0x271   :  { %4447 = vmatmul.mubr.f32.vlgmr.msra.gmra.mrb[0].mxu1 %v5933_v42  ;;  %5114 = vmatprep.subr.bf16.mxu0 %v5113_v24  ;;  %v1475_v42 = vand.u32 4294901760, %v1474_v32  ;;  %v1488_v28 = vsub.f32 %v6069_v35, %v1487_v43  ;;  %v6135_v32 = vsel %vm60_vm0, %v1934_v21, 0  ;;  %v5173_v14 = vpack.c.bf16 %v1494_v25, %v1487_v43 }
 0x273   :  { %v5121_v38 = vpack.c.bf16 %v1482_v31, %v1475_v42  ;;  %v1489_v20 = vand.u32 4294901760, %v1488_v28  ;;  %v1982_v42 = vand.u32 4294901760, %v6132_v23 }
 0x275   :  { %v5125_v37 = vpack.c.bf16 %v1496_v36, %v1489_v20  ;;  %v6148_v15 = vpack.c.bf16 %v1982_v42, %v1979_v34  ;;  %v5161_v36 = vpack.c.bf16 %v1452_v17, %v1445_v16  ;;  %v1936_v16 = vld [vmem:[#allocation5 + $0xe0] sm:$0xff]  ;;  %v1937_v17 = vld [vmem:[#allocation5 + $0xe8] sm:$0xff] }
 0x276   :  { %v1970_v26 = vsel %vm60_vm0, %v1937_v17, 0 }
 0x277   :  { %5194 = vmatprep.subr.bf16.mxu1 %v6148_v15  ;;  %v1994_v33 = vand.u32 4294901760, %v1970_v26 }
 0x278   :  { %5196 = vmatpush3.bf16.xpose.msra.mxu1 %v6148_v15 }
 0x344   :  { %v4448_v47 = vpop.f32.mrb[0].mxu1 }
 0x345   :  { %v5483_v55 = vadd.f32 %v4448_v47, %v3850_v46  ;;  %v1290_v56 = vpop.f32.mrb[1].mxu1 }
 0x346   :  { %v5484_v57 = vadd.f32 %v3850_v46, %v1290_v56 }
 0x347   :  { %v1301_v58 = vmax.f32 %v5483_v55, 0.0 }
 0x348   :  { %v1300_v0 = vmax.f32 %v5484_v57, 0.0 }
 0x349   :  { %v1323_v12 = vsel %vm60_vm0, %v1301_v58, 0  ;;  %v6233_v58 = vsub.f32 %v1970_v26, %v1994_v33 }
 0x34a   :  { %v6107_v50 = vand.u32 4294901760, %v1323_v12  ;;  %v1320_v63 = vsel %vm60_vm0, %v1300_v0, 0 }
 0x34b   :  { %v6110_v3 = vand.u32 4294901760, %v1320_v63 }
 0x34c   :  { %v6113_v2 = vsub.f32 %v1323_v12, %v6107_v50 }
 0x34d   :  { %v1423_v52 = vsub.f32 %v1320_v63, %v6110_v3 }
 0x34e   :  { %v1434_v53 = vand.u32 4294901760, %v6113_v2 }
 0x34f   :  { %v1424_v40 = vand.u32 4294901760, %v1423_v52 }
 0x350   :  { %v1435_v59 = vsub.f32 %v6113_v2, %v1434_v53 }
 0x351   :  { %v1425_v41 = vsub.f32 %v1423_v52, %v1424_v40 }
 0x352   :  { %v1436_v49 = vand.u32 4294901760, %v1435_v59 }
 0x353   :  { %v1426_v44 = vand.u32 4294901760, %v1425_v41 }
 0x355   :  { %4465 = vmatprep.mubr.f32.mxu0 %v1426_v44 }
 0x356   :  { %4466 = vmatmul.mubr.f32.vlgmr.msra.gmra.mrb[2].mxu0 %v1436_v49 }
 0x357   :  { %5116 = vmatpush3.bf16.xpose.msra.mxu0 %v5113_v24  ;;  %4484 = vmatprep.mubr.f32.mxu0 %v6110_v3  ;;  %v1935_v24 = vld [vmem:[#allocation5 + $0xd8] sm:$0xff] }
 0x358   :  { %5118 = vmatprep.subr.bf16.mxu0 %v5117_v4  ;;  %v6140_v31 = vsel %vm60_vm0, %v1935_v24, 0 }
 0x359   :  { %v1988_v28 = vand.u32 4294901760, %v6140_v31 }
 0x35b   :  { %v6276_v19 = vsub.f32 %v6140_v31, %v1988_v28 }
 0x35f   :  { %5120 = vmatpush3.bf16.xpose.msra.mxu0 %v5117_v4  ;;  %v3852_v4 = vld [vmem:[%s6676_s2 + $0x2] ss:$0 sm:$0xff] }
 0x360   :  { %5122 = vmatprep.subr.bf16.mxu0 %v5121_v38 }
 0x367   :  { %5124 = vmatpush3.bf16.xpose.msra.mxu0 %v5121_v38  ;;  %v1985_v38 = vand.u32 4294901760, %v6135_v32 }
 0x368   :  { %5126 = vmatprep.subr.bf16.mxu0 %v5125_v37 }
 0x369   :  { %v6154_v20 = vpack.c.bf16 %v1988_v28, %v1985_v38  ;;  %v6271_v6 = vsub.f32 %v6135_v32, %v1985_v38 }
 0x36b   :  { %5198 = vmatprep.subr.bf16.mxu1 %v6154_v20 }
 0x36c   :  { %5200 = vmatpush3.bf16.xpose.msra.mxu1 %v6154_v20 }
 0x36f   :  { %5128 = vmatpush3.bf16.xpose.msra.mxu0 %v5125_v37  ;;  %v5165_v37 = vpack.c.bf16 %v1466_v11, %v1459_v1  ;;  %v2109_v1 = vand.u32 4294901760, %v6233_v58 }
 0x370   :  { %5130 = vmatprep.subr.bf16.mxu0 %v5129_v18 }
 0x371   :  { %v2110_v12 = vsub.f32 %v6233_v58, %v2109_v1 }
 0x373   :  { %v2111_v63 = vand.u32 4294901760, %v2110_v12 }
 0x376   :  { %4485 = vmatmul.mubr.f32.vlgmr.msra.gmra.mrb[2].mxu0 %v6107_v50 }
 0x377   :  { %5132 = vmatpush3.bf16.xpose.msra.mxu0 %v5129_v18  ;;  %4503 = vmatprep.mubr.f32.mxu0 %v1423_v52  ;;  %v6214_v18 = vsub.f32 %v6129_v22, %v1979_v34 }
 0x378   :  { %5134 = vmatprep.subr.bf16.mxu0 %v5133_v5 }
 0x37f   :  { %5136 = vmatpush3.bf16.xpose.msra.mxu0 %v5133_v5 }
 0x380   :  { %5138 = vmatprep.subr.bf16.mxu0 %v6085_v29 }
 0x387   :  { %5140 = vmatpush3.bf16.xpose.msra.mxu0 %v6085_v29  ;;  %v6219_v29 = vsub.f32 %v6132_v23, %v1982_v42  ;;  %v2088_v42 = vand.u32 4294901760, %v6271_v6 }
 0x388   :  { %5142 = vmatprep.subr.bf16.mxu0 %v6089_v45 }
 0x389   :  { %v2081_v46 = vand.u32 4294901760, %v6219_v29  ;;  %v5225_v41 = vpack.c.bf16 %v6219_v29, %v6214_v18  ;;  %v2089_v28 = vsub.f32 %v6271_v6, %v2088_v42 }
 0x38b   :  { %v2082_v48 = vsub.f32 %v6219_v29, %v2081_v46 }
 0x38d   :  { %v2083_v55 = vand.u32 4294901760, %v2082_v48  ;;  %v2563_v48 = vld [vmem:[#allocation5 + $0x110] sm:$0xff] }
 0x38f   :  { %5144 = vmatpush3.bf16.xpose.msra.mxu0 %v6089_v45  ;;  %v2074_v45 = vand.u32 4294901760, %v6214_v18 }
 0x390   :  { %5146 = vmatprep.subr.bf16.mxu0 %v5974_v9 }
 0x391   :  { %v2075_v47 = vsub.f32 %v6214_v18, %v2074_v45 }
 0x393   :  { %v2076_v54 = vand.u32 4294901760, %v2075_v47  ;;  %v2562_v47 = vld [vmem:[#allocation5 + $0x108] sm:$0xff] }
 0x395   :  { %v5209_v56 = vpack.c.bf16 %v2083_v55, %v2076_v54  ;;  %v6306_v55 = vsel %vm60_vm0, %v2562_v47, 0 }
 0x396   :  { %4504 = vmatmul.mubr.f32.vlgmr.msra.gmra.mrb[2].mxu0 %v6113_v2 }
 0x397   :  { %5148 = vmatpush3.bf16.xpose.msra.mxu0 %v5974_v9  ;;  %4522 = vmatprep.mubr.f32.mxu0 %v1424_v40 }
 0x398   :  { %5150 = vmatprep.subr.bf16.mxu0 %v5980_v10 }
 0x39f   :  { %5152 = vmatpush3.bf16.xpose.msra.mxu0 %v5980_v10 }
 0x3a0   :  { %5154 = vmatprep.subr.bf16.mxu0 %v6029_v62 }
 0x3a7   :  { %5156 = vmatpush3.bf16.xpose.msra.mxu0 %v6029_v62 }
 0x3a8   :  { %5158 = vmatprep.subr.bf16.mxu0 %v6035_v7 }
 0x3af   :  { %5160 = vmatpush3.bf16.xpose.msra.mxu0 %v6035_v7 }
 0x3b0   :  { %5162 = vmatprep.subr.bf16.mxu0 %v5161_v36 }
 0x3b6   :  { %4523 = vmatmul.mubr.f32.vlgmr.msra.gmra.mrb[2].mxu0 %v1434_v53 }
 0x3b7   :  { %5164 = vmatpush3.bf16.xpose.msra.mxu0 %v5161_v36  ;;  %4541 = vmatprep.mubr.f32.mxu0 %v6110_v3  ;;  %v2095_v36 = vand.u32 4294901760, %v6276_v19 }
 0x3b8   :  { %5166 = vmatprep.subr.bf16.mxu0 %v5165_v37 }
 0x3bf   :  { %5168 = vmatpush3.bf16.xpose.msra.mxu0 %v5165_v37 }
 0x3c0   :  { %5170 = vmatprep.subr.bf16.mxu0 %v5169_v13 }
 0x3c7   :  { %5172 = vmatpush3.bf16.xpose.msra.mxu0 %v5169_v13 }
 0x3c8   :  { %5174 = vmatprep.subr.bf16.mxu0 %v5173_v14 }
 0x3cf   :  { %5176 = vmatpush3.bf16.xpose.msra.mxu0 %v5173_v14  ;;  %v2096_v14 = vsub.f32 %v6276_v19, %v2095_v36 }
 0x3d0   :  { %5178 = vmatprep.subr.bf16.mxu0 %v5974_v9 }
 0x3d6   :  { %4542 = vmatmul.mubr.f32.vlgmr.msra.gmra.mrb[2].mxu0 %v6107_v50 }
 0x3d7   :  { %5180 = vmatpush3.bf16.xpose.msra.mxu0 %v5974_v9  ;;  %4560 = vmatprep.mubr.f32.mxu0 %v6110_v3  ;;  %v1967_v9 = vsel %vm60_vm0, %v1936_v16, 0 }
 0x3d8   :  { %5182 = vmatprep.subr.bf16.mxu0 %v5980_v10  ;;  %v1991_v27 = vand.u32 4294901760, %v1967_v9 }
 0x3da   :  { %v6203_v30 = vpack.c.bf16 %v1994_v33, %v1991_v27  ;;  %v6231_v57 = vsub.f32 %v1967_v9, %v1991_v27  ;;  %v2090_v27 = vand.u32 4294901760, %v2089_v28  ;;  %v2097_v33 = vand.u32 4294901760, %v2096_v14 }
 0x3dc   :  { %5202 = vmatprep.subr.bf16.mxu1 %v6203_v30  ;;  %v2102_v0 = vand.u32 4294901760, %v6231_v57  ;;  %v6259_v44 = vpack.c.bf16 %v6233_v58, %v6231_v57 }
 0x3dd   :  { %5204 = vmatpush3.bf16.xpose.msra.mxu1 %v6203_v30 }
 0x3de   :  { %v2103_v11 = vsub.f32 %v6231_v57, %v2102_v0  ;;  %v5265_v18 = vpack.c.bf16 %v2109_v1, %v2102_v0 }
 0x3df   :  { %5184 = vmatpush3.bf16.xpose.msra.mxu0 %v5980_v10  ;;  %v1938_v10 = vld [vmem:[#allocation5 + $0xf0] sm:$0xff] }
 0x3e0   :  { %5186 = vmatprep.subr.bf16.mxu0 %v6029_v62 }
 0x3e7   :  { %5188 = vmatpush3.bf16.xpose.msra.mxu0 %v6029_v62  ;;  %v1939_v62 = vld [vmem:[#allocation5 + $0xf8] sm:$0xff] }
 0x3e8   :  { %5190 = vmatprep.subr.bf16.mxu0 %v6035_v7  ;;  %v1976_v35 = vsel %vm60_vm0, %v1939_v62, 0 }
 0x3e9   :  { %v2000_v43 = vand.u32 4294901760, %v1976_v35 }
 0x3eb   :  { %v6245_v8 = vsub.f32 %v1976_v35, %v2000_v43  ;;  %v5213_v35 = vpack.c.bf16 %v2097_v33, %v2090_v27 }
 0x3ed   :  { %v2123_v52 = vand.u32 4294901760, %v6245_v8 }
 0x3ef   :  { %5192 = vmatpush3.bf16.xpose.msra.mxu0 %v6035_v7  ;;  %v1973_v7 = vsel %vm60_vm0, %v1938_v10, 0  ;;  %v2124_v40 = vsub.f32 %v6245_v8, %v2123_v52 }
 0x3f0   :  { %v1997_v39 = vand.u32 4294901760, %v1973_v7 }
 0x3f1   :  { %v2125_v60 = vand.u32 4294901760, %v2124_v40 }
 0x3f2   :  { %v6209_v25 = vpack.c.bf16 %v2000_v43, %v1997_v39  ;;  %v6243_v2 = vsub.f32 %v1973_v7, %v1997_v39  ;;  %v5229_v39 = vpack.c.bf16 %v6276_v19, %v6271_v6  ;;  %v2561_v43 = vld [vmem:[#allocation5 + $0x100] sm:$0xff] }
 0x3f3   :  { %v6303_v54 = vsel %vm60_vm0, %v2561_v43, 0 }
 0x3f4   :  { %5206 = vmatprep.subr.bf16.mxu1 %v6209_v25  ;;  %v2116_v51 = vand.u32 4294901760, %v6243_v2  ;;  %v6263_v49 = vpack.c.bf16 %v6245_v8, %v6243_v2  ;;  %v2608_v12 = vand.u32 4294901760, %v6303_v54 }
 0x3f5   :  { %5208 = vmatpush3.bf16.xpose.msra.mxu1 %v6209_v25 }
 0x3f6   :  { %4561 = vmatmul.mubr.f32.vlgmr.msra.gmra.mrb[2].mxu0 %v6107_v50  ;;  %5210 = vmatprep.subr.bf16.mxu1 %v5209_v56  ;;  %v2104_v50 = vand.u32 4294901760, %v2103_v11  ;;  %v2117_v53 = vsub.f32 %v6243_v2, %v2116_v51  ;;  %v6309_v11 = vsel %vm60_vm0, %v2563_v48, 0  ;;  %v5269_v29 = vpack.c.bf16 %v2123_v52, %v2116_v51 }
 0x3f8   :  { %v5217_v3 = vpack.c.bf16 %v2111_v63, %v2104_v50  ;;  %v2118_v59 = vand.u32 4294901760, %v2117_v53  ;;  %v2611_v50 = vand.u32 4294901760, %v6306_v55 }
 0x3fa   :  { %v5221_v61 = vpack.c.bf16 %v2125_v60, %v2118_v59  ;;  %v6322_v40 = vpack.c.bf16 %v2611_v50, %v2608_v12  ;;  %v5257_v60 = vpack.c.bf16 %v2081_v46, %v2074_v45  ;;  %v2565_v45 = vld [vmem:[#allocation5 + $0x120] sm:$0xff]  ;;  %v2566_v46 = vld [vmem:[#allocation5 + $0x128] sm:$0xff] }
 0x3fb   :  { %v2599_v57 = vsel %vm60_vm0, %v2566_v46, 0 }
 0x3fc   :  { %5290 = vmatprep.subr.bf16.mxu0 %v6322_v40  ;;  %v2623_v0 = vand.u32 4294901760, %v2599_v57 }
 0x3fd   :  { %5292 = vmatpush3.bf16.xpose.msra.mxu0 %v6322_v40 }
 0x4c9   :  { %v4562_v5 = vpop.f32.mrb[2].mxu0 }
 0x4ca   :  { %v5485_v21 = vadd.f32 %v4562_v5, %v3852_v4  ;;  %v1919_v22 = vpop.f32.mrb[3].mxu0 }
 0x4cb   :  { %v5486_v23 = vadd.f32 %v3852_v4, %v1919_v22 }
 0x4cc   :  { %v1930_v24 = vmax.f32 %v5485_v21, 0.0 }
 0x4cd   :  { %v1929_v34 = vmax.f32 %v5486_v23, 0.0 }
 0x4ce   :  { %v1952_v37 = vsel %vm60_vm0, %v1930_v24, 0  ;;  %v6407_v24 = vsub.f32 %v2599_v57, %v2623_v0 }
 0x4cf   :  { %v6281_v13 = vand.u32 4294901760, %v1952_v37  ;;  %v1949_v32 = vsel %vm60_vm0, %v1929_v34, 0 }
 0x4d0   :  { %v6284_v38 = vand.u32 4294901760, %v1949_v32 }
 0x4d1   :  { %v6287_v31 = vsub.f32 %v1952_v37, %v6281_v13 }
 0x4d2   :  { %v2052_v16 = vsub.f32 %v1949_v32, %v6284_v38 }
 0x4d3   :  { %v2063_v17 = vand.u32 4294901760, %v6287_v31 }
 0x4d4   :  { %v2053_v9 = vand.u32 4294901760, %v2052_v16 }
 0x4d5   :  { %v2064_v26 = vsub.f32 %v6287_v31, %v2063_v17 }
 0x4d6   :  { %v2054_v10 = vsub.f32 %v2052_v16, %v2053_v9 }
 0x4d7   :  { %v2065_v7 = vand.u32 4294901760, %v2064_v26 }
 0x4d8   :  { %v2055_v62 = vand.u32 4294901760, %v2054_v10 }
 0x4da   :  { %4579 = vmatprep.mubr.f32.mxu1 %v2055_v62 }
 0x4db   :  { %4580 = vmatmul.mubr.f32.vlgmr.msra.gmra.mrb[2].mxu1 %v2065_v7 }
 0x4dc   :  { %5212 = vmatpush3.bf16.xpose.msra.mxu1 %v5209_v56  ;;  %4598 = vmatprep.mubr.f32.mxu1 %v6284_v38  ;;  %v2564_v56 = vld [vmem:[#allocation5 + $0x118] sm:$0xff] }
 0x4dd   :  { %5214 = vmatprep.subr.bf16.mxu1 %v5213_v35  ;;  %v6314_v63 = vsel %vm60_vm0, %v2564_v56, 0 }
 0x4de   :  { %v2617_v53 = vand.u32 4294901760, %v6314_v63 }
 0x4e0   :  { %v6450_v47 = vsub.f32 %v6314_v63, %v2617_v53 }
 0x4e4   :  { %5216 = vmatpush3.bf16.xpose.msra.mxu1 %v5213_v35  ;;  %v3854_v35 = vld [vmem:[%s6676_s2 + $0x3] ss:$0 sm:$0xff] }
 0x4e5   :  { %5218 = vmatprep.subr.bf16.mxu1 %v5217_v3 }
 0x4ec   :  { %5220 = vmatpush3.bf16.xpose.msra.mxu1 %v5217_v3  ;;  %v2614_v3 = vand.u32 4294901760, %v6309_v11 }
 0x4ed   :  { %5222 = vmatprep.subr.bf16.mxu1 %v5221_v61 }
 0x4ee   :  { %v6328_v59 = vpack.c.bf16 %v2617_v53, %v2614_v3  ;;  %v6445_v43 = vsub.f32 %v6309_v11, %v2614_v3 }
 0x4f0   :  { %5294 = vmatprep.subr.bf16.mxu0 %v6328_v59 }
 0x4f1   :  { %5296 = vmatpush3.bf16.xpose.msra.mxu0 %v6328_v59 }
 0x4f4   :  { %5224 = vmatpush3.bf16.xpose.msra.mxu1 %v5221_v61  ;;  %v5261_v61 = vpack.c.bf16 %v2095_v36, %v2088_v42  ;;  %v2738_v42 = vand.u32 4294901760, %v6407_v24 }
 0x4f5   :  { %5226 = vmatprep.subr.bf16.mxu1 %v5225_v41 }
 0x4f6   :  { %v2739_v37 = vsub.f32 %v6407_v24, %v2738_v42 }
 0x4f8   :  { %v2740_v32 = vand.u32 4294901760, %v2739_v37 }
 0x4fb   :  { %4599 = vmatmul.mubr.f32.vlgmr.msra.gmra.mrb[2].mxu1 %v6281_v13 }
 0x4fc   :  { %5228 = vmatpush3.bf16.xpose.msra.mxu1 %v5225_v41  ;;  %4617 = vmatprep.mubr.f32.mxu1 %v2052_v16  ;;  %v6388_v41 = vsub.f32 %v6303_v54, %v2608_v12 }
 0x4fd   :  { %5230 = vmatprep.subr.bf16.mxu1 %v5229_v39 }
 0x504   :  { %5232 = vmatpush3.bf16.xpose.msra.mxu1 %v5229_v39 }
 0x505   :  { %5234 = vmatprep.subr.bf16.mxu1 %v6259_v44 }
 0x50c   :  { %5236 = vmatpush3.bf16.xpose.msra.mxu1 %v6259_v44  ;;  %v6393_v44 = vsub.f32 %v6306_v55, %v2611_v50  ;;  %v2717_v50 = vand.u32 4294901760, %v6445_v43 }
 0x50d   :  { %5238 = vmatprep.subr.bf16.mxu1 %v6263_v49 }
 0x50e   :  { %v2710_v4 = vand.u32 4294901760, %v6393_v44  ;;  %v5321_v10 = vpack.c.bf16 %v6393_v44, %v6388_v41  ;;  %v2718_v53 = vsub.f32 %v6445_v43, %v2717_v50 }
 0x510   :  { %v2711_v6 = vsub.f32 %v6393_v44, %v2710_v4 }
 0x512   :  { %v2712_v21 = vand.u32 4294901760, %v2711_v6  ;;  %v3192_v6 = vld [vmem:[#allocation5 + $0x150] sm:$0xff] }
 0x514   :  { %5240 = vmatpush3.bf16.xpose.msra.mxu1 %v6263_v49  ;;  %v2703_v49 = vand.u32 4294901760, %v6388_v41 }
 0x515   :  { %5242 = vmatprep.subr.bf16.mxu1 %v6148_v15 }
 0x516   :  { %v2704_v5 = vsub.f32 %v6388_v41, %v2703_v49 }
 0x518   :  { %v2705_v19 = vand.u32 4294901760, %v2704_v5  ;;  %v3191_v5 = vld [vmem:[#allocation5 + $0x148] sm:$0xff] }
 0x51a   :  { %v5305_v22 = vpack.c.bf16 %v2712_v21, %v2705_v19  ;;  %v6480_v21 = vsel %vm60_vm0, %v3191_v5, 0 }
 0x51b   :  { %4618 = vmatmul.mubr.f32.vlgmr.msra.gmra.mrb[2].mxu1 %v6287_v31 }
 0x51c   :  { %5244 = vmatpush3.bf16.xpose.msra.mxu1 %v6148_v15  ;;  %4636 = vmatprep.mubr.f32.mxu1 %v2053_v9 }
 0x51d   :  { %5246 = vmatprep.subr.bf16.mxu1 %v6154_v20 }
 0x524   :  { %5248 = vmatpush3.bf16.xpose.msra.mxu1 %v6154_v20 }
 0x525   :  { %5250 = vmatprep.subr.bf16.mxu1 %v6203_v30 }
 0x52c   :  { %5252 = vmatpush3.bf16.xpose.msra.mxu1 %v6203_v30 }
 0x52d   :  { %5254 = vmatprep.subr.bf16.mxu1 %v6209_v25 }
 0x534   :  { %5256 = vmatpush3.bf16.xpose.msra.mxu1 %v6209_v25 }
 0x535   :  { %5258 = vmatprep.subr.bf16.mxu1 %v5257_v60 }
 0x53b   :  { %4637 = vmatmul.mubr.f32.vlgmr.msra.gmra.mrb[2].mxu1 %v2063_v17 }
 0x53c   :  { %5260 = vmatpush3.bf16.xpose.msra.mxu1 %v5257_v60  ;;  %4655 = vmatprep.mubr.f32.mxu1 %v6284_v38  ;;  %v2724_v60 = vand.u32 4294901760, %v6450_v47 }
 0x53d   :  { %5262 = vmatprep.subr.bf16.mxu1 %v5261_v61 }
 0x544   :  { %5264 = vmatpush3.bf16.xpose.msra.mxu1 %v5261_v61 }
 0x545   :  { %5266 = vmatprep.subr.bf16.mxu1 %v5265_v18 }
 0x54c   :  { %5268 = vmatpush3.bf16.xpose.msra.mxu1 %v5265_v18 }
 0x54d   :  { %5270 = vmatprep.subr.bf16.mxu1 %v5269_v29 }
 0x554   :  { %5272 = vmatpush3.bf16.xpose.msra.mxu1 %v5269_v29  ;;  %v2725_v29 = vsub.f32 %v6450_v47, %v2724_v60 }
 0x555   :  { %5274 = vmatprep.subr.bf16.mxu1 %v6148_v15 }
 0x55b   :  { %4656 = vmatmul.mubr.f32.vlgmr.msra.gmra.mrb[2].mxu1 %v6281_v13 }
 0x55c   :  { %5276 = vmatpush3.bf16.xpose.msra.mxu1 %v6148_v15  ;;  %4674 = vmatprep.mubr.f32.mxu1 %v6284_v38  ;;  %v2596_v15 = vsel %vm60_vm0, %v2565_v45, 0 }
 0x55d   :  { %5278 = vmatprep.subr.bf16.mxu1 %v6154_v20  ;;  %v2620_v58 = vand.u32 4294901760, %v2596_v15 }
 0x55f   :  { %v6377_v1 = vpack.c.bf16 %v2623_v0, %v2620_v58  ;;  %v6405_v23 = vsub.f32 %v2596_v15, %v2620_v58  ;;  %v2719_v58 = vand.u32 4294901760, %v2718_v53  ;;  %v2726_v0 = vand.u32 4294901760, %v2725_v29 }
 0x561   :  { %5298 = vmatprep.subr.bf16.mxu0 %v6377_v1  ;;  %v2731_v34 = vand.u32 4294901760, %v6405_v23  ;;  %v6433_v62 = vpack.c.bf16 %v6407_v24, %v6405_v23 }
 0x562   :  { %5300 = vmatpush3.bf16.xpose.msra.mxu0 %v6377_v1 }
 0x563   :  { %v2732_v36 = vsub.f32 %v6405_v23, %v2731_v34  ;;  %v5361_v41 = vpack.c.bf16 %v2738_v42, %v2731_v34 }
 0x564   :  { %5280 = vmatpush3.bf16.xpose.msra.mxu1 %v6154_v20  ;;  %v2567_v20 = vld [vmem:[#allocation5 + $0x130] sm:$0xff] }
 0x565   :  { %5282 = vmatprep.subr.bf16.mxu1 %v6203_v30 }
 0x56c   :  { %5284 = vmatpush3.bf16.xpose.msra.mxu1 %v6203_v30  ;;  %v2568_v30 = vld [vmem:[#allocation5 + $0x138] sm:$0xff] }
 0x56d   :  { %5286 = vmatprep.subr.bf16.mxu1 %v6209_v25  ;;  %v2605_v2 = vsel %vm60_vm0, %v2568_v30, 0 }
 0x56e   :  { %v2629_v51 = vand.u32 4294901760, %v2605_v2 }
 0x570   :  { %v6419_v28 = vsub.f32 %v2605_v2, %v2629_v51  ;;  %v5309_v2 = vpack.c.bf16 %v2726_v0, %v2719_v58 }
 0x572   :  { %v2752_v16 = vand.u32 4294901760, %v6419_v28 }
 0x574   :  { %5288 = vmatpush3.bf16.xpose.msra.mxu1 %v6209_v25  ;;  %v2602_v25 = vsel %vm60_vm0, %v2567_v20, 0  ;;  %v2753_v9 = vsub.f32 %v6419_v28, %v2752_v16 }
 0x575   :  { %v2626_v8 = vand.u32 4294901760, %v2602_v25 }
 0x576   :  { %v2754_v27 = vand.u32 4294901760, %v2753_v9 }
 0x577   :  { %v6383_v52 = vpack.c.bf16 %v2629_v51, %v2626_v8  ;;  %v6417_v31 = vsub.f32 %v2602_v25, %v2626_v8  ;;  %v5325_v8 = vpack.c.bf16 %v6450_v47, %v6445_v43  ;;  %v3190_v51 = vld [vmem:[#allocation5 + $0x140] sm:$0xff] }
 0x578   :  { %v6477_v19 = vsel %vm60_vm0, %v3190_v51, 0 }
 0x579   :  { %5302 = vmatprep.subr.bf16.mxu0 %v6383_v52  ;;  %v2745_v14 = vand.u32 4294901760, %v6417_v31  ;;  %v6437_v7 = vpack.c.bf16 %v6419_v28, %v6417_v31  ;;  %v3237_v37 = vand.u32 4294901760, %v6477_v19 }
 0x57a   :  { %5304 = vmatpush3.bf16.xpose.msra.mxu0 %v6383_v52 }
 0x57b   :  { %4675 = vmatmul.mubr.f32.vlgmr.msra.gmra.mrb[2].mxu1 %v6281_v13  ;;  %5306 = vmatprep.subr.bf16.mxu0 %v5305_v22  ;;  %v2733_v13 = vand.u32 4294901760, %v2732_v36  ;;  %v2746_v17 = vsub.f32 %v6417_v31, %v2745_v14  ;;  %v6483_v36 = vsel %vm60_vm0, %v3192_v6, 0  ;;  %v5365_v44 = vpack.c.bf16 %v2752_v16, %v2745_v14 }
 0x57d   :  { %v5313_v38 = vpack.c.bf16 %v2740_v32, %v2733_v13  ;;  %v2747_v26 = vand.u32 4294901760, %v2746_v17  ;;  %v3240_v13 = vand.u32 4294901760, %v6480_v21 }
 0x57f   :  { %v5317_v33 = vpack.c.bf16 %v2754_v27, %v2747_v26  ;;  %v6496_v9 = vpack.c.bf16 %v3240_v13, %v3237_v37  ;;  %v5353_v27 = vpack.c.bf16 %v2710_v4, %v2703_v49  ;;  %v3194_v49 = vld [vmem:[#allocation5 + $0x160] sm:$0xff]  ;;  %v3195_v4 = vld [vmem:[#allocation5 + $0x168] sm:$0xff] }
 0x580   :  { %v3228_v23 = vsel %vm60_vm0, %v3195_v4, 0 }
 0x581   :  { %5386 = vmatprep.subr.bf16.mxu1 %v6496_v9  ;;  %v3252_v34 = vand.u32 4294901760, %v3228_v23 }
 0x582   :  { %5388 = vmatpush3.bf16.xpose.msra.mxu1 %v6496_v9 }
 0x64e   :  { %v4676_v39 = vpop.f32.mrb[2].mxu1 }
 0x64f   :  { %v5487_v48 = vadd.f32 %v4676_v39, %v3854_v35  ;;  %v2548_v54 = vpop.f32.mrb[3].mxu1 }
 0x650   :  { %v5488_v55 = vadd.f32 %v3854_v35, %v2548_v54 }
 0x651   :  { %v2559_v56 = vmax.f32 %v5487_v48, 0.0 }
 0x652   :  { %v2558_v12 = vmax.f32 %v5488_v55, 0.0 }
 0x653   :  { %v2581_v61 = vsel %vm60_vm0, %v2559_v56, 0  ;;  %v6581_v56 = vsub.f32 %v3228_v23, %v3252_v34 }
 0x654   :  { %v6455_v18 = vand.u32 4294901760, %v2581_v61  ;;  %v2578_v11 = vsel %vm60_vm0, %v2558_v12, 0 }
 0x655   :  { %v6458_v3 = vand.u32 4294901760, %v2578_v11 }
 0x656   :  { %v6461_v63 = vsub.f32 %v2581_v61, %v6455_v18 }
 0x657   :  { %v2681_v45 = vsub.f32 %v2578_v11, %v6458_v3 }
 0x658   :  { %v2692_v46 = vand.u32 4294901760, %v6461_v63 }
 0x659   :  { %v2682_v15 = vand.u32 4294901760, %v2681_v45 }
 0x65a   :  { %v2693_v57 = vsub.f32 %v6461_v63, %v2692_v46 }
 0x65b   :  { %v2683_v20 = vsub.f32 %v2681_v45, %v2682_v15 }
 0x65c   :  { %v2694_v25 = vand.u32 4294901760, %v2693_v57 }
 0x65d   :  { %v2684_v30 = vand.u32 4294901760, %v2683_v20 }
 0x65f   :  { %4693 = vmatprep.mubr.f32.mxu0 %v2684_v30 }
 0x660   :  { %4694 = vmatmul.mubr.f32.vlgmr.msra.gmra.mrb[4].mxu0 %v2694_v25 }
 0x661   :  { %5308 = vmatpush3.bf16.xpose.msra.mxu0 %v5305_v22  ;;  %4712 = vmatprep.mubr.f32.mxu0 %v6458_v3  ;;  %v3193_v22 = vld [vmem:[#allocation5 + $0x158] sm:$0xff] }
 0x662   :  { %5310 = vmatprep.subr.bf16.mxu0 %v5309_v2  ;;  %v6488_v32 = vsel %vm60_vm0, %v3193_v22, 0 }
 0x663   :  { %v3246_v17 = vand.u32 4294901760, %v6488_v32 }
 0x665   :  { %v3352_v5 = vsub.f32 %v6488_v32, %v3246_v17 }
 0x669   :  { %5312 = vmatpush3.bf16.xpose.msra.mxu0 %v5309_v2  ;;  %v3856_v2 = vld [vmem:[%s6676_s2 + $0x4] ss:$0 sm:$0xff] }
 0x66a   :  { %5314 = vmatprep.subr.bf16.mxu0 %v5313_v38 }
 0x671   :  { %5316 = vmatpush3.bf16.xpose.msra.mxu0 %v5313_v38  ;;  %v3243_v38 = vand.u32 4294901760, %v6483_v36 }
 0x672   :  { %5318 = vmatprep.subr.bf16.mxu0 %v5317_v33 }
 0x673   :  { %v6502_v26 = vpack.c.bf16 %v3246_v17, %v3243_v38  ;;  %v3345_v51 = vsub.f32 %v6483_v36, %v3243_v38 }
 0x675   :  { %5390 = vmatprep.subr.bf16.mxu1 %v6502_v26 }
 0x676   :  { %5392 = vmatpush3.bf16.xpose.msra.mxu1 %v6502_v26 }
 0x679   :  { %5320 = vmatpush3.bf16.xpose.msra.mxu0 %v5317_v33  ;;  %v5357_v33 = vpack.c.bf16 %v2724_v60, %v2717_v50  ;;  %v3367_v50 = vand.u32 4294901760, %v6581_v56 }
 0x67a   :  { %5322 = vmatprep.subr.bf16.mxu0 %v5321_v10 }
 0x67b   :  { %v3368_v61 = vsub.f32 %v6581_v56, %v3367_v50 }
 0x67d   :  { %v3369_v11 = vand.u32 4294901760, %v3368_v61 }
 0x680   :  { %4713 = vmatmul.mubr.f32.vlgmr.msra.gmra.mrb[4].mxu0 %v6455_v18 }
 0x681   :  { %5324 = vmatpush3.bf16.xpose.msra.mxu0 %v5321_v10  ;;  %4731 = vmatprep.mubr.f32.mxu0 %v2681_v45  ;;  %v6562_v10 = vsub.f32 %v6477_v19, %v3237_v37 }
 0x682   :  { %5326 = vmatprep.subr.bf16.mxu0 %v5325_v8 }
 0x689   :  { %5328 = vmatpush3.bf16.xpose.msra.mxu0 %v5325_v8 }
 0x68a   :  { %5330 = vmatprep.subr.bf16.mxu0 %v6433_v62 }
 0x691   :  { %5332 = vmatpush3.bf16.xpose.msra.mxu0 %v6433_v62  ;;  %v6567_v62 = vsub.f32 %v6480_v21, %v3240_v13  ;;  %v3346_v13 = vand.u32 4294901760, %v3345_v51 }
 0x692   :  { %5334 = vmatprep.subr.bf16.mxu0 %v6437_v7 }
 0x693   :  { %v3339_v35 = vand.u32 4294901760, %v6567_v62  ;;  %v5417_v20 = vpack.c.bf16 %v6567_v62, %v6562_v10  ;;  %v3347_v38 = vsub.f32 %v3345_v51, %v3346_v13 }
 0x695   :  { %v3340_v43 = vsub.f32 %v6567_v62, %v3339_v35  ;;  %v3858_v62 = vld [vmem:[%s6676_s2 + $0x5] ss:$0 sm:$0xff]  ;;  %s5610_s2 = scalar_lea.vmem %s3836_s24, 256 }
 0x696   :  { %p5611_p2 = scmp.ne.s32.totalorder %s3836_s24, %s5610_s2  ;;  %p5616_p4 = scmp.lt.s32.totalorder %s5610_s2, %s5610_s2 }
 0x697   :  { %v3341_v48 = vand.u32 4294901760, %v3340_v43 }
 0x698   :  { %p5617_p5 = por %p5616_p4, %p5615_p3 }
 0x699   :  { %5336 = vmatpush3.bf16.xpose.msra.mxu0 %v6437_v7  ;;  %v3332_v7 = vand.u32 4294901760, %v6562_v10 }
 0x69a   :  { %5338 = vmatprep.subr.bf16.mxu0 %v6322_v40  ;;  %p5618_p6 = pnand %p5617_p5, %p5611_p2 }
 0x69b   :  { %v3333_v39 = vsub.f32 %v6562_v10, %v3332_v7 }
 0x69d   :  { %v3334_v47 = vand.u32 4294901760, %v3333_v39 }
 0x69f   :  { %v5401_v54 = vpack.c.bf16 %v3341_v48, %v3334_v47 }
 0x6a0   :  { %4732 = vmatmul.mubr.f32.vlgmr.msra.gmra.mrb[4].mxu0 %v6461_v63 }
 0x6a1   :  { %5340 = vmatpush3.bf16.xpose.msra.mxu0 %v6322_v40  ;;  %4750 = vmatprep.mubr.f32.mxu0 %v2682_v15 }
 0x6a2   :  { %5342 = vmatprep.subr.bf16.mxu0 %v6328_v59 }
 0x6a9   :  { %5344 = vmatpush3.bf16.xpose.msra.mxu0 %v6328_v59 }
 0x6aa   :  { %5346 = vmatprep.subr.bf16.mxu0 %v6377_v1 }
 0x6b1   :  { %5348 = vmatpush3.bf16.xpose.msra.mxu0 %v6377_v1 }
 0x6b2   :  { %5350 = vmatprep.subr.bf16.mxu0 %v6383_v52 }
 0x6b9   :  { %5352 = vmatpush3.bf16.xpose.msra.mxu0 %v6383_v52 }
 0x6ba   :  { %5354 = vmatprep.subr.bf16.mxu0 %v5353_v27 }
 0x6c0   :  { %4751 = vmatmul.mubr.f32.vlgmr.msra.gmra.mrb[4].mxu0 %v2692_v46 }
 0x6c1   :  { %5356 = vmatpush3.bf16.xpose.msra.mxu0 %v5353_v27  ;;  %4769 = vmatprep.mubr.f32.mxu0 %v6458_v3  ;;  %v3353_v27 = vand.u32 4294901760, %v3352_v5 }
 0x6c2   :  { %5358 = vmatprep.subr.bf16.mxu0 %v5357_v33 }
 0x6c3   :  { %v3354_v4 = vsub.f32 %v3352_v5, %v3353_v27  ;;  %v5453_v39 = vpack.c.bf16 %v3353_v27, %v3346_v13 }
 0x6c9   :  { %5360 = vmatpush3.bf16.xpose.msra.mxu0 %v5357_v33 }
 0x6ca   :  { %5362 = vmatprep.subr.bf16.mxu0 %v5361_v41 }
 0x6d1   :  { %5364 = vmatpush3.bf16.xpose.msra.mxu0 %v5361_v41 }
 0x6d2   :  { %5366 = vmatprep.subr.bf16.mxu0 %v5365_v44 }
 0x6d9   :  { %5368 = vmatpush3.bf16.xpose.msra.mxu0 %v5365_v44 }
 0x6da   :  { %5370 = vmatprep.subr.bf16.mxu0 %v6322_v40 }
 0x6e0   :  { %4770 = vmatmul.mubr.f32.vlgmr.msra.gmra.mrb[4].mxu0 %v6455_v18 }
 0x6e1   :  { %5372 = vmatpush3.bf16.xpose.msra.mxu0 %v6322_v40  ;;  %4788 = vmatprep.mubr.f32.mxu0 %v6458_v3  ;;  %v3225_v40 = vsel %vm60_vm0, %v3194_v49, 0 }
 0x6e2   :  { %5374 = vmatprep.subr.bf16.mxu0 %v6328_v59  ;;  %v3249_v24 = vand.u32 4294901760, %v3225_v40 }
 0x6e4   :  { %v6551_v42 = vpack.c.bf16 %v3252_v34, %v3249_v24  ;;  %v6579_v55 = vsub.f32 %v3225_v40, %v3249_v24  ;;  %v3348_v24 = vand.u32 4294901760, %v3347_v38  ;;  %v3355_v34 = vand.u32 4294901760, %v3354_v4 }
 0x6e6   :  { %5394 = vmatprep.subr.bf16.mxu1 %v6551_v42  ;;  %v3360_v12 = vand.u32 4294901760, %v6579_v55  ;;  %v5425_v30 = vpack.c.bf16 %v6581_v56, %v6579_v55 }
 0x6e7   :  { %5396 = vmatpush3.bf16.xpose.msra.mxu1 %v6551_v42 }
 0x6e8   :  { %v3361_v60 = vsub.f32 %v6579_v55, %v3360_v12  ;;  %v5457_v43 = vpack.c.bf16 %v3367_v50, %v3360_v12 }
 0x6e9   :  { %5376 = vmatpush3.bf16.xpose.msra.mxu0 %v6328_v59  ;;  %v3196_v59 = vld [vmem:[#allocation5 + $0x170] sm:$0xff] }
 0x6ea   :  { %5378 = vmatprep.subr.bf16.mxu0 %v6377_v1 }
 0x6f1   :  { %5380 = vmatpush3.bf16.xpose.msra.mxu0 %v6377_v1  ;;  %v3197_v1 = vld [vmem:[#allocation5 + $0x178] sm:$0xff] }
 0x6f2   :  { %5382 = vmatprep.subr.bf16.mxu0 %v6383_v52  ;;  %v3234_v31 = vsel %vm60_vm0, %v3197_v1, 0 }
 0x6f3   :  { %v3258_v14 = vand.u32 4294901760, %v3234_v31 }
 0x6f5   :  { %v6593_v53 = vsub.f32 %v3234_v31, %v3258_v14  ;;  %v5405_v31 = vpack.c.bf16 %v3355_v34, %v3348_v24 }
 0x6f7   :  { %v3381_v45 = vand.u32 4294901760, %v6593_v53 }
 0x6f9   :  { %5384 = vmatpush3.bf16.xpose.msra.mxu0 %v6383_v52  ;;  %v3231_v52 = vsel %vm60_vm0, %v3196_v59, 0  ;;  %v3382_v15 = vsub.f32 %v6593_v53, %v3381_v45 }
 0x6fa   :  { %v3255_v28 = vand.u32 4294901760, %v3231_v52 }
 0x6fb   :  { %v3383_v58 = vand.u32 4294901760, %v3382_v15 }
 0x6fc   :  { %v6557_v16 = vpack.c.bf16 %v3258_v14, %v3255_v28  ;;  %v6591_v63 = vsub.f32 %v3231_v52, %v3255_v28  ;;  %v5421_v28 = vpack.c.bf16 %v3352_v5, %v3345_v51  ;;  %v5449_v14 = vpack.c.bf16 %v3339_v35, %v3332_v7 }
 0x6fe   :  { %5398 = vmatprep.subr.bf16.mxu1 %v6557_v16  ;;  %v3374_v29 = vand.u32 4294901760, %v6591_v63  ;;  %v5429_v25 = vpack.c.bf16 %v6593_v53, %v6591_v63 }
 0x6ff   :  { %5400 = vmatpush3.bf16.xpose.msra.mxu1 %v6557_v16 }
 0x700   :  { %4789 = vmatmul.mubr.f32.vlgmr.msra.gmra.mrb[4].mxu0 %v6455_v18  ;;  %5402 = vmatprep.subr.bf16.mxu1 %v5401_v54  ;;  %v3362_v18 = vand.u32 4294901760, %v3361_v60  ;;  %v3375_v46 = vsub.f32 %v6591_v63, %v3374_v29  ;;  %v5461_v10 = vpack.c.bf16 %v3381_v45, %v3374_v29 }
 0x702   :  { %v5409_v3 = vpack.c.bf16 %v3369_v11, %v3362_v18  ;;  %v3376_v57 = vand.u32 4294901760, %v3375_v46 }
 0x704   :  { %v5413_v0 = vpack.c.bf16 %v3383_v58, %v3376_v57 }
 0x7d3   :  { %v4790_v8 = vpop.f32.mrb[4].mxu0 }
 0x7d4   :  { %v5489_v6 = vadd.f32 %v4790_v8, %v3856_v2  ;;  %v3177_v19 = vpop.f32.mrb[5].mxu0 }
 0x7d5   :  { %v5490_v21 = vadd.f32 %v3856_v2, %v3177_v19 }
 0x7d6   :  { %v3188_v22 = vmax.f32 %v5489_v6, 0.0 }
 0x7d7   :  { %v3187_v37 = vmax.f32 %v5490_v21, 0.0 }
 0x7d8   :  { %v3210_v33 = vsel %vm60_vm0, %v3188_v22, 0 }
 0x7d9   :  { %v6619_v41 = vand.u32 4294901760, %v3210_v33  ;;  %v3207_v44 = vsel %vm60_vm0, %v3187_v37, 0 }
 0x7da   :  { %v3309_v49 = vand.u32 4294901760, %v3207_v44 }
 0x7db   :  { %v3320_v36 = vsub.f32 %v3210_v33, %v6619_v41 }
 0x7dc   :  { %v3310_v40 = vsub.f32 %v3207_v44, %v3309_v49 }
 0x7dd   :  { %v3321_v32 = vand.u32 4294901760, %v3320_v36 }
 0x7de   :  { %v3311_v17 = vand.u32 4294901760, %v3310_v40 }
 0x7df   :  { %v3322_v23 = vsub.f32 %v3320_v36, %v3321_v32 }
 0x7e0   :  { %v3312_v59 = vsub.f32 %v3310_v40, %v3311_v17 }
 0x7e1   :  { %v3323_v52 = vand.u32 4294901760, %v3322_v23 }
 0x7e2   :  { %v3313_v1 = vand.u32 4294901760, %v3312_v59 }
 0x7e4   :  { %4807 = vmatprep.mubr.f32.mxu1 %v3313_v1 }
 0x7e5   :  { %4808 = vmatmul.mubr.f32.vlgmr.msra.gmra.mrb[4].mxu1 %v3323_v52 }
 0x7e6   :  { %5404 = vmatpush3.bf16.xpose.msra.mxu1 %v5401_v54  ;;  %4826 = vmatprep.mubr.f32.mxu1 %v3309_v49 }
 0x7e7   :  { %5406 = vmatprep.subr.bf16.mxu1 %v5405_v31 }
 0x7ee   :  { %5408 = vmatpush3.bf16.xpose.msra.mxu1 %v5405_v31 }
 0x7ef   :  { %5410 = vmatprep.subr.bf16.mxu1 %v5409_v3 }
 0x7f6   :  { %5412 = vmatpush3.bf16.xpose.msra.mxu1 %v5409_v3 }
 0x7f7   :  { %5414 = vmatprep.subr.bf16.mxu1 %v5413_v0 }
 0x7fe   :  { %5416 = vmatpush3.bf16.xpose.msra.mxu1 %v5413_v0 }
 0x7ff   :  { %5418 = vmatprep.subr.bf16.mxu1 %v5417_v20 }
 0x805   :  { %4827 = vmatmul.mubr.f32.vlgmr.msra.gmra.mrb[4].mxu1 %v6619_v41 }
 0x806   :  { %5420 = vmatpush3.bf16.xpose.msra.mxu1 %v5417_v20  ;;  %4845 = vmatprep.mubr.f32.mxu1 %v3310_v40 }
 0x807   :  { %5422 = vmatprep.subr.bf16.mxu1 %v5421_v28 }
 0x80e   :  { %5424 = vmatpush3.bf16.xpose.msra.mxu1 %v5421_v28 }
 0x80f   :  { %5426 = vmatprep.subr.bf16.mxu1 %v5425_v30 }
 0x816   :  { %5428 = vmatpush3.bf16.xpose.msra.mxu1 %v5425_v30 }
 0x817   :  { %5430 = vmatprep.subr.bf16.mxu1 %v5429_v25 }
 0x81e   :  { %5432 = vmatpush3.bf16.xpose.msra.mxu1 %v5429_v25 }
 0x81f   :  { %5434 = vmatprep.subr.bf16.mxu1 %v6496_v9 }
 0x825   :  { %4846 = vmatmul.mubr.f32.vlgmr.msra.gmra.mrb[4].mxu1 %v3320_v36 }
 0x826   :  { %5436 = vmatpush3.bf16.xpose.msra.mxu1 %v6496_v9  ;;  %4864 = vmatprep.mubr.f32.mxu1 %v3311_v17 }
 0x827   :  { %5438 = vmatprep.subr.bf16.mxu1 %v6502_v26 }
 0x82e   :  { %5440 = vmatpush3.bf16.xpose.msra.mxu1 %v6502_v26 }
 0x82f   :  { %5442 = vmatprep.subr.bf16.mxu1 %v6551_v42 }
 0x836   :  { %5444 = vmatpush3.bf16.xpose.msra.mxu1 %v6551_v42 }
 0x837   :  { %5446 = vmatprep.subr.bf16.mxu1 %v6557_v16 }
 0x83e   :  { %5448 = vmatpush3.bf16.xpose.msra.mxu1 %v6557_v16 }
 0x83f   :  { %5450 = vmatprep.subr.bf16.mxu1 %v5449_v14 }
 0x845   :  { %4865 = vmatmul.mubr.f32.vlgmr.msra.gmra.mrb[4].mxu1 %v3321_v32 }
 0x846   :  { %5452 = vmatpush3.bf16.xpose.msra.mxu1 %v5449_v14  ;;  %4883 = vmatprep.mubr.f32.mxu1 %v3309_v49 }
 0x847   :  { %5454 = vmatprep.subr.bf16.mxu1 %v5453_v39 }
 0x84e   :  { %5456 = vmatpush3.bf16.xpose.msra.mxu1 %v5453_v39 }
 0x84f   :  { %5458 = vmatprep.subr.bf16.mxu1 %v5457_v43 }
 0x856   :  { %5460 = vmatpush3.bf16.xpose.msra.mxu1 %v5457_v43 }
 0x857   :  { %5462 = vmatprep.subr.bf16.mxu1 %v5461_v10 }
 0x85e   :  { %5464 = vmatpush3.bf16.xpose.msra.mxu1 %v5461_v10 }
 0x85f   :  { %5466 = vmatprep.subr.bf16.mxu1 %v6496_v9 }
 0x865   :  { %4884 = vmatmul.mubr.f32.vlgmr.msra.gmra.mrb[4].mxu1 %v6619_v41 }
 0x866   :  { %5468 = vmatpush3.bf16.xpose.msra.mxu1 %v6496_v9  ;;  %4902 = vmatprep.mubr.f32.mxu1 %v3309_v49 }
 0x867   :  { %5470 = vmatprep.subr.bf16.mxu1 %v6502_v26 }
 0x86e   :  { %5472 = vmatpush3.bf16.xpose.msra.mxu1 %v6502_v26 }
 0x86f   :  { %5474 = vmatprep.subr.bf16.mxu1 %v6551_v42 }
 0x876   :  { %5476 = vmatpush3.bf16.xpose.msra.mxu1 %v6551_v42 }
 0x877   :  { %5478 = vmatprep.subr.bf16.mxu1 %v6557_v16 }
 0x87e   :  { %5480 = vmatpush3.bf16.xpose.msra.mxu1 %v6557_v16 }
 0x885   :  { %4903 = vmatmul.mubr.f32.vlgmr.msra.gmra.mrb[4].mxu1 %v6619_v41 }
 0x958   :  { %v4904_v9 = vpop.f32.mrb[4].mxu1 }
 0x959   :  { %v5491_v7 = vadd.f32 %v4904_v9, %v3858_v62  ;;  %v3806_v35 = vpop.f32.mrb[5].mxu1 }
 0x95a   :  { %v5492_v47 = vadd.f32 %v3858_v62, %v3806_v35 }
 0x95b   :  { %v3860_v48 = vmul.f32 -1.442695, %v5491_v7 }
 0x95c   :  { %v3859_v26 = vmul.f32 -1.442695, %v5492_v47 }
 0x95d   :  { %5558 = vpow2.f32 %v3860_v48 }
 0x95e   :  { %5560 = vpow2.f32 %v3859_v26 }
 0x967   :  { %v5559_v54 = vpop.eup %5558 }
 0x968   :  { %v5561_v42 = vpop.eup %5560  ;;  %v3823_v55 = vadd.f32 1.0, %v5559_v54 }
 0x969   :  { %v3822_v56 = vadd.f32 1.0, %v5561_v42 }
 0x96a   :  { %5562 = vrcp.f32 %v3823_v55 }
 0x96b   :  { %5564 = vrcp.f32 %v3822_v56 }
 0x974   :  { %v5563_v16 = vpop.eup %5562 }
 0x975   :  { %v5565_v12 = vpop.eup %5564  ;;  %3829 = vst.msk [vmem:[#allocation7 + $0x8] sm:$0xff] %vm60_vm0, %v5563_v16 }
 0x976   :  { %3828 = vst.msk [vmem:[#allocation7] sm:$0xff] %vm60_vm0, %v5565_v12 }
 0x977   :  { %5621 = shalt.err (!%p5618_p6)
}
 0x978   :  { %s5622_s27 = scalar_lea.hbm %s6677_s3, 256 }
 0x979   :  { %p5623_p7 = scmp.ne.s32.totalorder %s6677_s3, %s5622_s27  ;;  %p5626_p8 = scmp.lt.u32.totalorder %s5622_s27, %s6677_s3 }
 0x97b   :  { %p5628_p9 = pnand %p5626_p8, %p5623_p7 }
 0x97d   :  { %5631 = shalt.err (!%p5628_p9)
}
 0x97e   :  { %3841 = dma.vmem_to_hbm [thread:$0]  %s3836_s24, 256, %s6677_s3, [#allocation4], %s5639_s22, %s5639_s22, %s5640_s23  }
 0x97f   :  { %5636 = dma.done.wait [#allocation4], 256  }
 0x980   :  { %5637 = vsyncadd [#allocation4], 4294967040 }
 0x981   :  { %3845 = vsyncpa [#allocation3], 1 }
 0x982   :  { %3846 = vsyncpa [#allocation6], 1 }
 0x983   :  { %3847 = vsyncpa [#allocation4], 1 }

</bundles_post_ra>
